<compile_context>
chip_gen: v7x
topology: tpu7x:2x2x1
jax: 0.10.0
libtpu: 0.0.40
codegen_flags: <defaults>
</compile_context>

<pallas_src>
import functools
import math

import jax
import jax.numpy as jnp
from jax.experimental import pallas as pl
from jax.experimental.pallas import tpu as pltpu


LN_EPS = 1e-12


# ----------------------- chip-aware tiling configuration -----------------------

def _vmem_capacity_bytes():
    try:
        cap = getattr(pltpu.get_tpu_info(), "vmem_capacity_bytes", None)
        if cap:
            return int(cap)
    except Exception:
        pass
    return 64 * 1024 * 1024   # conservative fallback (v7x per-TensorCore)


_VMEM_CAP = _vmem_capacity_bytes()
_BIG_VMEM = _VMEM_CAP >= 96 * 1024 * 1024            # v5e / v6e (128 MiB VMEM)
VMEM_LIMIT = (100 * 1024 * 1024 if _BIG_VMEM
              else min(44 * 1024 * 1024, int(_VMEM_CAP * 0.7)))
ROW_TILE_TARGET = 512 if _BIG_VMEM else 256          # rows (M = B*S) per grid step
LANE_TILE_TARGET = 1024 if _BIG_VMEM else 512        # contraction (K) tile
INTER_TILE_TARGET = 1024 if _BIG_VMEM else 512       # FFN intermediate (I) tile


def _cparams(dims):
    return pltpu.CompilerParams(dimension_semantics=dims,
                                vmem_limit_bytes=VMEM_LIMIT)


def _round_up(x, q):
    return ((x + q - 1) // q) * q


def _row_tile(m, target):
    """(tile, padded_M): tile is a multiple of 16 (bf16 sublane packing);
    M is padded up to a multiple of the tile (no giant-block fallback)."""
    q = 16
    tgt = max(q, (target // q) * q)
    if m <= tgt:
        tm = _round_up(m, q)
        return tm, tm
    return tgt, _round_up(m, tgt)


def _fit_lane(dim, target):
    """Largest multiple of 128 that divides `dim` and is <= target; full dim
    if dim <= target or nothing divides."""
    if dim <= target:
        return dim
    t = (target // 128) * 128
    while t >= 128:
        if dim % t == 0:
            return t
        t -= 128
    return dim   # TODO(synk): pad weight dims not divisible by 128 instead.


def _pad_rows(a, rows):
    if a.shape[0] == rows:
        return a
    return jnp.pad(a, ((0, rows - a.shape[0]),) + ((0, 0),) * (a.ndim - 1))


def _assert_vmem(name, est_bytes):
    """Trace-time sanity check: bad tile choices fail loudly, not with a
    silent VMEM OOM on v7x's smaller budget."""
    if est_bytes > VMEM_LIMIT:
        raise ValueError(
            f"{name}: estimated VMEM {est_bytes / 2**20:.1f} MiB exceeds "
            f"per-call limit {VMEM_LIMIT / 2**20:.1f} MiB — shrink tiles")


def _heads_per_group(n_heads, head_dim):
    """Heads handled per attention grid step. The resulting lane width
    (heads_per_group * head_dim) is a multiple of 128 or the full H, keeping
    every block shape legal and the output store lane-dense."""
    hidden = n_heads * head_dim
    if hidden <= 256:
        return n_heads
    for g in range(1, n_heads + 1):
        if n_heads % g == 0 and (g * head_dim) % 128 == 0 and g * head_dim <= 256:
            return g
    return n_heads


# ----------------------------- Pallas kernels -----------------------------

def _layernorm_kernel(x_ref, g_ref, b_ref, o_ref, *, eps):
    x = x_ref[...].astype(jnp.float32)
    mean = jnp.mean(x, axis=-1, keepdims=True)
    var = jnp.mean((x - mean) ** 2, axis=-1, keepdims=True)
    inv = jax.lax.rsqrt(var + eps)
    o_ref[...] = ((x - mean) * inv * g_ref[...] + b_ref[...]).astype(o_ref.dtype)


def layernorm(x, gamma, beta, eps=LN_EPS, out_dtype=jnp.bfloat16):
    """Row-tiled LayerNorm (no residual) — used for the embedding LN.
    Input is bf16 (upcast in-kernel for the statistics)."""
    M, H = x.shape
    tm, Mp = _row_tile(M, ROW_TILE_TARGET)
    xp = _pad_rows(x, Mp)
    out = pl.pallas_call(
        functools.partial(_layernorm_kernel, eps=eps),
        out_shape=jax.ShapeDtypeStruct((Mp, H), out_dtype),
        grid=(Mp // tm,),
        in_specs=[
            pl.BlockSpec((tm, H), lambda i: (i, 0)),
            pl.BlockSpec((1, H), lambda i: (0, 0)),
            pl.BlockSpec((1, H), lambda i: (0, 0)),
        ],
        out_specs=pl.BlockSpec((tm, H), lambda i: (i, 0)),
        compiler_params=_cparams(("parallel",)),
    )(xp, gamma.reshape(1, H), beta.reshape(1, H))
    return out[:M] if Mp != M else out


def _attn_kernel(x_ref, wq_ref, wk_ref, wv_ref, bq_ref, bk_ref, bv_ref,
                 m_ref, o_ref, ctx_ref, *, heads, head_dim, scale):
    x = x_ref[0]                                    # (S, H) bf16
    mask = m_ref[0]                                 # (1, S) f32 additive bias
    # Fused QKV projection for this head group (weights stay in VMEM; the
    # (B, S, 3H) activation never touches HBM).
    q = (jnp.dot(x, wq_ref[...], preferred_element_type=jnp.float32)
         + bq_ref[...]).astype(jnp.bfloat16)        # (S, G*Dh)
    k = (jnp.dot(x, wk_ref[...], preferred_element_type=jnp.float32)
         + bk_ref[...]).astype(jnp.bfloat16)
    v = (jnp.dot(x, wv_ref[...], preferred_element_type=jnp.float32)
         + bv_ref[...]).astype(jnp.bfloat16)
    for h in range(heads):                          # small static unroll (<=4)
        sl = slice(h * head_dim, (h + 1) * head_dim)
        s = jax.lax.dot_general(q[:, sl], k[:, sl], (((1,), (1,)), ((), ())),
                                preferred_element_type=jnp.float32)
        s = s * scale + mask
        s = s - jnp.max(s, axis=-1, keepdims=True)
        p = jnp.exp(s)
        p = p * pl.reciprocal(jnp.sum(p, axis=-1, keepdims=True), approx=True)
        ctx_ref[:, sl] = jnp.dot(p.astype(jnp.bfloat16), v[:, sl],
                                 preferred_element_type=jnp.float32)
    # One cast + lane-dense store of the whole head-group context block.
    o_ref[0] = ctx_ref[...].astype(o_ref.dtype)


def fused_qkv_attention(x, wq, wk, wv, bq, bk, bv, mask_bias, n_heads,
                        out_dtype=jnp.bfloat16):
    """x: (B, S, H) bf16; w_*: (H, H) bf16; b_*: (H,) f32;
    mask_bias: (B, 1, S) additive (-1e4 on padding). Returns (B, S, H) bf16.
    Grid is (batch, head_group) for megacore parallelism."""
    B, S, H = x.shape
    Dh = H // n_heads
    G = _heads_per_group(n_heads, Dh)
    nG = n_heads // G
    GD = G * Dh
    scale = 1.0 / math.sqrt(Dh)

    # Conservative 4-bytes/elem estimate: double-buffered ins/outs + scratch +
    # in-kernel q/k/v + one (S, S) score block.
    est = 4 * (2 * (S * H + 3 * H * GD + 3 * GD + S) + 2 * S * GD
               + S * GD + 3 * S * GD + S * S)
    _assert_vmem("fused_qkv_attention", est)

    # TODO(synk): for very long sequences switch to a flash-style
    # online-softmax grid over (q-tile, kv-tile) instead of full (S, S) scores.
    return pl.pallas_call(
        functools.partial(_attn_kernel, heads=G, head_dim=Dh, scale=scale),
        out_shape=jax.ShapeDtypeStruct((B, S, H), out_dtype),
        grid=(B, nG),
        in_specs=[
            pl.BlockSpec((1, S, H), lambda b, g: (b, 0, 0)),
            pl.BlockSpec((H, GD), lambda b, g: (0, g)),
            pl.BlockSpec((H, GD), lambda b, g: (0, g)),
            pl.BlockSpec((H, GD), lambda b, g: (0, g)),
            pl.BlockSpec((1, GD), lambda b, g: (0, g)),
            pl.BlockSpec((1, GD), lambda b, g: (0, g)),
            pl.BlockSpec((1, GD), lambda b, g: (0, g)),
            pl.BlockSpec((1, 1, S), lambda b, g: (b, 0, 0)),
        ],
        out_specs=pl.BlockSpec((1, S, GD), lambda b, g: (b, 0, g)),
        scratch_shapes=[pltpu.VMEM((S, GD), jnp.float32)],
        compiler_params=_cparams(("parallel", "parallel")),
    )(x, wq, wk, wv, bq.reshape(1, H), bk.reshape(1, H), bv.reshape(1, H),
      mask_bias)


def _linear_res_ln_kernel(x_ref, w_ref, b_ref, r_ref, g_ref, be_ref,
                          o_ref, acc_ref, *, eps):
    @pl.when(pl.program_id(1) == 0)
    def _():
        acc_ref[...] = jnp.zeros_like(acc_ref)

    acc_ref[...] += jnp.dot(x_ref[...], w_ref[...],
                            preferred_element_type=jnp.float32)

    @pl.when(pl.program_id(1) == pl.num_programs(1) - 1)
    def _():
        y = acc_ref[...] + b_ref[...] + r_ref[...].astype(jnp.float32)
        mean = jnp.mean(y, axis=-1, keepdims=True)
        var = jnp.mean((y - mean) ** 2, axis=-1, keepdims=True)
        inv = jax.lax.rsqrt(var + eps)
        o_ref[...] = ((y - mean) * inv * g_ref[...] + be_ref[...]).astype(o_ref.dtype)


def linear_residual_layernorm(x, w, b, residual, gamma, beta,
                              eps=LN_EPS, out_dtype=jnp.bfloat16):
    """LayerNorm(x @ w + b + residual); (M-tile, K-tile) grid, full N in VMEM."""
    M, K = x.shape
    N = w.shape[1]
    tm, Mp = _row_tile(M, ROW_TILE_TARGET)
    tk = _fit_lane(K, LANE_TILE_TARGET)
    xp = _pad_rows(x, Mp)
    rp = _pad_rows(residual, Mp)

    est = 4 * (2 * (tm * tk + tk * N + N + tm * N + 2 * N) + 2 * tm * N + tm * N)
    _assert_vmem("linear_residual_layernorm", est)

    out = pl.pallas_call(
        functools.partial(_linear_res_ln_kernel, eps=eps),
        out_shape=jax.ShapeDtypeStruct((Mp, N), out_dtype),
        grid=(Mp // tm, K // tk),
        in_specs=[
            pl.BlockSpec((tm, tk), lambda i, k: (i, k)),
            pl.BlockSpec((tk, N), lambda i, k: (k, 0)),
            pl.BlockSpec((1, N), lambda i, k: (0, 0)),
            pl.BlockSpec((tm, N), lambda i, k: (i, 0)),
            pl.BlockSpec((1, N), lambda i, k: (0, 0)),
            pl.BlockSpec((1, N), lambda i, k: (0, 0)),
        ],
        out_specs=pl.BlockSpec((tm, N), lambda i, k: (i, 0)),
        scratch_shapes=[pltpu.VMEM((tm, N), jnp.float32)],
        compiler_params=_cparams(("parallel", "arbitrary")),
    )(xp, w, b.reshape(1, N), rp, gamma.reshape(1, N), beta.reshape(1, N))
    return out[:M] if Mp != M else out


def _ffn_ln_kernel(x_ref, w1_ref, b1_ref, w2_ref, b2_ref, g_ref, be_ref,
                   o_ref, acc_ref, *, eps):
    j = pl.program_id(1)

    @pl.when(j == 0)
    def _():
        acc_ref[...] = jnp.zeros_like(acc_ref)

    # GELU is elementwise over the intermediate, so accumulating
    # gelu(x @ w1[:, blk] + b1[blk]) @ w2[blk, :] per I-block is exact; the
    # (tm, I) intermediate and full FFN weights are never resident at once.
    h = (jnp.dot(x_ref[...], w1_ref[...], preferred_element_type=jnp.float32)
         + b1_ref[...])
    # TODO(synk): HF BERT default act is exact (erf) GELU; tanh approx used
    # because erf lowering in Mosaic is not guaranteed.
    h = jax.nn.gelu(h, approximate=True).astype(w2_ref.dtype)
    acc_ref[...] += jnp.dot(h, w2_ref[...], preferred_element_type=jnp.float32)

    @pl.when(j == pl.num_programs(1) - 1)
    def _():
        y = acc_ref[...] + b2_ref[...] + x_ref[...].astype(jnp.float32)
        mean = jnp.mean(y, axis=-1, keepdims=True)
        var = jnp.mean((y - mean) ** 2, axis=-1, keepdims=True)
        inv = jax.lax.rsqrt(var + eps)
        o_ref[...] = ((y - mean) * inv * g_ref[...] + be_ref[...]).astype(o_ref.dtype)


def ffn_layernorm(x, w1, b1, w2, b2, gamma, beta,
                  eps=LN_EPS, out_dtype=jnp.bfloat16):
    """Fused FFN: LayerNorm(gelu(x@w1+b1)@w2 + b2 + x), tiled over (M, I)."""
    M, H = x.shape
    I = w1.shape[1]
    tm, Mp = _row_tile(M, ROW_TILE_TARGET)
    ti = _fit_lane(I, INTER_TILE_TARGET)
    xp = _pad_rows(x, Mp)

    est = 4 * (2 * (tm * H + H * ti + ti + ti * H + 3 * H) + 2 * tm * H
               + tm * H + tm * ti)
    _assert_vmem("ffn_layernorm", est)

    out = pl.pallas_call(
        functools.partial(_ffn_ln_kernel, eps=eps),
        out_shape=jax.ShapeDtypeStruct((Mp, H), out_dtype),
        grid=(Mp // tm, I // ti),
        in_specs=[
            pl.BlockSpec((tm, H), lambda i, j: (i, 0)),
            pl.BlockSpec((H, ti), lambda i, j: (0, j)),
            pl.BlockSpec((1, ti), lambda i, j: (0, j)),
            pl.BlockSpec((ti, H), lambda i, j: (j, 0)),
            pl.BlockSpec((1, H), lambda i, j: (0, 0)),
            pl.BlockSpec((1, H), lambda i, j: (0, 0)),
            pl.BlockSpec((1, H), lambda i, j: (0, 0)),
        ],
        out_specs=pl.BlockSpec((tm, H), lambda i, j: (i, 0)),
        scratch_shapes=[pltpu.VMEM((tm, H), jnp.float32)],
        compiler_params=_cparams(("parallel", "arbitrary")),
    )(xp, w1, b1.reshape(1, I), w2, b2.reshape(1, H),
      gamma.reshape(1, H), beta.reshape(1, H))
    return out[:M] if Mp != M else out


# --------------------------- parameter creation ----------------------------

def init_params(key, *, vocab, max_pos, hidden, n_layers, inter):
    std = 0.02

    def normal(k, shape, dtype=jnp.float32):
        return (std * jax.random.normal(k, shape, jnp.float32)).astype(dtype)

    keys = iter(jax.random.split(key, 8 + n_layers * 8))
    p = {
        "word_emb": normal(next(keys), (vocab, hidden)),
        "pos_emb": normal(next(keys), (max_pos, hidden)),
        "type_emb": normal(next(keys), (2, hidden)),
        "emb_ln_g": jnp.ones((hidden,), jnp.float32),
        "emb_ln_b": jnp.zeros((hidden,), jnp.float32),
        "layers": [],
    }
    for _ in range(n_layers):
        layer = {
            "w_q": normal(next(keys), (hidden, hidden), jnp.bfloat16),
            "w_k": normal(next(keys), (hidden, hidden), jnp.bfloat16),
            "w_v": normal(next(keys), (hidden, hidden), jnp.bfloat16),
            "b_q": jnp.zeros((hidden,), jnp.float32),
            "b_k": jnp.zeros((hidden,), jnp.float32),
            "b_v": jnp.zeros((hidden,), jnp.float32),
            "wo": normal(next(keys), (hidden, hidden), jnp.bfloat16),
            "bo": jnp.zeros((hidden,), jnp.float32),
            "attn_ln_g": jnp.ones((hidden,), jnp.float32),
            "attn_ln_b": jnp.zeros((hidden,), jnp.float32),
            "w_inter": normal(next(keys), (hidden, inter), jnp.bfloat16),
            "b_inter": jnp.zeros((inter,), jnp.float32),
            "w_out": normal(next(keys), (inter, hidden), jnp.bfloat16),
            "b_out": jnp.zeros((hidden,), jnp.float32),
            "out_ln_g": jnp.ones((hidden,), jnp.float32),
            "out_ln_b": jnp.zeros((hidden,), jnp.float32),
        }
        p["layers"].append(layer)
    return p


# ------------------------------- BERT forward -------------------------------

def bert_encoder(params, token_ids, att_mask, *, n_heads):
    """token_ids: (B, S) int32; att_mask: (B, S) int32 -> (B, S, H) bf16."""
    B, S = token_ids.shape
    H = params["word_emb"].shape[1]

    # Embedding gathers are glue (plain JAX); sum in f32, stream bf16 to LN.
    word = jnp.take(params["word_emb"], token_ids, axis=0)           # (B,S,H)
    pos = params["pos_emb"][:S][None, :, :]                          # (1,S,H)
    typ = params["type_emb"][0][None, None, :]                       # (1,1,H)
    emb = (word + pos + typ).astype(jnp.bfloat16).reshape(B * S, H)
    x = layernorm(emb, params["emb_ln_g"], params["emb_ln_b"])       # (B*S,H) bf16

    # Additive attention-mask bias (HF convention: (1 - mask) * -10000).
    mask_bias = ((1.0 - att_mask.astype(jnp.float32)) * -10000.0).reshape(B, 1, S)

    for lyr in params["layers"]:
        # Fused QKV projection + multi-head attention (per batch x head-group).
        ctx = fused_qkv_attention(
            x.reshape(B, S, H),
            lyr["w_q"], lyr["w_k"], lyr["w_v"],
            lyr["b_q"], lyr["b_k"], lyr["b_v"],
            mask_bias, n_heads)
        # Fused output projection + residual + LayerNorm.
        x = linear_residual_layernorm(ctx.reshape(B * S, H), lyr["wo"], lyr["bo"],
                                      x, lyr["attn_ln_g"], lyr["attn_ln_b"])
        # Fused FFN (+ GELU + residual + LayerNorm), intermediate tiled over I.
        x = ffn_layernorm(x, lyr["w_inter"], lyr["b_inter"],
                          lyr["w_out"], lyr["b_out"],
                          lyr["out_ln_g"], lyr["out_ln_b"])

    return x.reshape(B, S, H)


def entity_start_state(head_pos, sequence_output, max_length):
    """head_pos: (B, 2) int32; sequence_output: (B, S, H) -> (B, 2*H)."""
    hp = jnp.where((head_pos == -1) | (head_pos >= max_length), 0, head_pos)
    b_idx = jnp.arange(sequence_output.shape[0])
    h0 = sequence_output[b_idx, hp[:, 0]]
    h1 = sequence_output[b_idx, hp[:, 1]]
    return jnp.concatenate([h0, h1], axis=-1)


def bert_forward(params, token_ids, att_mask, head_pos, *, n_heads, max_length):
    seq_out = bert_encoder(params, token_ids, att_mask, n_heads=n_heads)
    return entity_start_state(head_pos, seq_out, max_length).astype(jnp.float32)


def bert_forward_classname(params, token_ids, att_mask, *, n_heads):
    """`is_classname=True` branch: return the [CLS] (position 0) states."""
    seq_out = bert_encoder(params, token_ids, att_mask, n_heads=n_heads)
    return seq_out[:, 0, :].astype(jnp.float32)


# ----------------------------------- main -----------------------------------

if __name__ == "__main__":
    # Small synthetic BERT config.
    B, S, H = 2, 16, 64
    N_HEADS, N_LAYERS, INTER, VOCAB = 2, 2, 128, 128
    MAX_LENGTH = S

    key = jax.random.PRNGKey(0)
    k_param, k_tok = jax.random.split(key)

    params = init_params(k_param, vocab=VOCAB, max_pos=S, hidden=H,
                         n_layers=N_LAYERS, inter=INTER)

    # "Tokenized" inputs (tokenizer itself is host-side string processing —
    # no TPU-kernel equivalent).
    token_ids = jax.random.randint(k_tok, (B, S), 0, VOCAB, dtype=jnp.int32)
    lengths = jnp.array([S, 10], dtype=jnp.int32)
    att_mask = (jnp.arange(S)[None, :] < lengths[:, None]).astype(jnp.int32)
    head_pos = jnp.array([[1, 5], [2, -1]], dtype=jnp.int32)  # -1 -> position 0

    fwd = jax.jit(functools.partial(bert_forward, n_heads=N_HEADS,
                                    max_length=MAX_LENGTH))
    out = fwd(params, token_ids, att_mask, head_pos)
    jax.block_until_ready(out)
    assert out.shape == (B, 2 * H), out.shape
    assert jnp.all(jnp.isfinite(out))
    print("KERNEL_OK")
</pallas_src>

<mosaic_0001>
module attributes {stable_mosaic.version = 11 : i64} {
  func.func @_layernorm_kernel(%arg0: i32, %arg1: memref<32x64xbf16, #tpu.memory_space<vmem>>, %arg2: memref<1x64xf32, #tpu.memory_space<vmem>>, %arg3: memref<1x64xf32, #tpu.memory_space<vmem>>, %arg4: memref<32x64xbf16, #tpu.memory_space<vmem>>) attributes {dimension_semantics = [#tpu.dimension_semantics<parallel>], iteration_bounds = array<i64: 1>, scalar_prefetch = 0 : i64, scratch_operands = 0 : i64, tpu.core_type = #tpu.core_type<tc>, window_params = [{transform_indices = @transform_0, window_bounds = array<i64: 32, 64>}, {pipeline_mode = #tpu.pipeline_mode<synchronous>, transform_indices = @transform_1, window_bounds = array<i64: 1, 64>}, {pipeline_mode = #tpu.pipeline_mode<synchronous>, transform_indices = @transform_2, window_bounds = array<i64: 1, 64>}, {transform_indices = @transform_3, window_bounds = array<i64: 32, 64>}]} {
    %c0 = arith.constant 0 : index
    %c0_0 = arith.constant 0 : index
    %0 = vector.load %arg1[%c0, %c0_0] : memref<32x64xbf16, #tpu.memory_space<vmem>>, vector<32x64xbf16>
    %1 = arith.extf %0 : vector<32x64xbf16> to vector<32x64xf32>
    %cst = arith.constant dense<0.000000e+00> : vector<32xf32>
    %2 = vector.multi_reduction <add>, %1, %cst [1] : vector<32x64xf32> to vector<32xf32>
    %3 = vector.shape_cast %2 : vector<32xf32> to vector<32x1xf32>
    %cst_1 = arith.constant 6.400000e+01 : f32
    %4 = vector.broadcast %cst_1 : f32 to vector<32x1xf32>
    %5 = arith.divf %3, %4 : vector<32x1xf32>
    %6 = vector.broadcast %5 : vector<32x1xf32> to vector<32x64xf32>
    %7 = arith.subf %1, %6 : vector<32x64xf32>
    %8 = arith.mulf %7, %7 : vector<32x64xf32>
    %cst_2 = arith.constant dense<0.000000e+00> : vector<32xf32>
    %9 = vector.multi_reduction <add>, %8, %cst_2 [1] : vector<32x64xf32> to vector<32xf32>
    %10 = vector.shape_cast %9 : vector<32xf32> to vector<32x1xf32>
    %cst_3 = arith.constant 6.400000e+01 : f32
    %11 = vector.broadcast %cst_3 : f32 to vector<32x1xf32>
    %12 = arith.divf %10, %11 : vector<32x1xf32>
    %cst_4 = arith.constant 9.99999996E-13 : f32
    %13 = vector.broadcast %cst_4 : f32 to vector<32x1xf32>
    %14 = arith.addf %12, %13 : vector<32x1xf32>
    %15 = math.rsqrt %14 : vector<32x1xf32>
    %16 = vector.broadcast %5 : vector<32x1xf32> to vector<32x64xf32>
    %17 = arith.subf %1, %16 : vector<32x64xf32>
    %18 = vector.broadcast %15 : vector<32x1xf32> to vector<32x64xf32>
    %19 = arith.mulf %17, %18 : vector<32x64xf32>
    %c0_5 = arith.constant 0 : index
    %c0_6 = arith.constant 0 : index
    %20 = vector.load %arg2[%c0_5, %c0_6] : memref<1x64xf32, #tpu.memory_space<vmem>>, vector<1x64xf32>
    %21 = vector.broadcast %20 : vector<1x64xf32> to vector<32x64xf32>
    %22 = arith.mulf %19, %21 : vector<32x64xf32>
    %c0_7 = arith.constant 0 : index
    %c0_8 = arith.constant 0 : index
    %23 = vector.load %arg3[%c0_7, %c0_8] : memref<1x64xf32, #tpu.memory_space<vmem>>, vector<1x64xf32>
    %24 = vector.broadcast %23 : vector<1x64xf32> to vector<32x64xf32>
    %25 = arith.addf %22, %24 : vector<32x64xf32>
    %26 = arith.truncf %25 : vector<32x64xf32> to vector<32x64xbf16>
    %c0_9 = arith.constant 0 : index
    %c0_10 = arith.constant 0 : index
    %27 = vector.load %arg4[%c0_9, %c0_10] : memref<32x64xbf16, #tpu.memory_space<vmem>>, vector<32x64xbf16>
    tpu.vector_store %arg4[%c0_9, %c0_10], %26 {strides = array<i32>} : memref<32x64xbf16, #tpu.memory_space<vmem>>, vector<32x64xbf16>,
    return
  }
  func.func @transform_0(%arg0: i32) -> (i32, i32) {
    %c0_i32 = arith.constant 0 : i32
    %c0_i32_0 = arith.constant 0 : i32
    return %arg0, %c0_i32 : i32, i32
  }
  func.func @transform_1(%arg0: i32) -> (i32, i32) {
    %c0_i32 = arith.constant 0 : i32
    %c0_i32_0 = arith.constant 0 : i32
    %c0_i32_1 = arith.constant 0 : i32
    return %c0_i32, %c0_i32_0 : i32, i32
  }
  func.func @transform_2(%arg0: i32) -> (i32, i32) {
    %c0_i32 = arith.constant 0 : i32
    %c0_i32_0 = arith.constant 0 : i32
    %c0_i32_1 = arith.constant 0 : i32
    return %c0_i32, %c0_i32_0 : i32, i32
  }
  func.func @transform_3(%arg0: i32) -> (i32, i32) {
    %c0_i32 = arith.constant 0 : i32
    %c0_i32_0 = arith.constant 0 : i32
    return %arg0, %c0_i32 : i32, i32
  }
}

module attributes {stable_mosaic.version = 11 : i64} {
  func.func @_linear_res_ln_kernel(%arg0: i32, %arg1: i32, %arg2: memref<32x64xbf16, #tpu.memory_space<vmem>>, %arg3: memref<64x64xbf16, #tpu.memory_space<vmem>>, %arg4: memref<1x64xf32, #tpu.memory_space<vmem>>, %arg5: memref<32x64xbf16, #tpu.memory_space<vmem>>, %arg6: memref<1x64xf32, #tpu.memory_space<vmem>>, %arg7: memref<1x64xf32, #tpu.memory_space<vmem>>, %arg8: memref<32x64xbf16, #tpu.memory_space<vmem>>, %arg9: memref<32x64xf32, #tpu.memory_space<vmem>>) attributes {dimension_semantics = [#tpu.dimension_semantics<parallel>, #tpu.dimension_semantics<arbitrary>], iteration_bounds = array<i64: 1, 1>, scalar_prefetch = 0 : i64, scratch_operands = 1 : i64, tpu.core_type = #tpu.core_type<tc>, window_params = [{transform_indices = @transform_0, window_bounds = array<i64: 32, 64>}, {transform_indices = @transform_1, window_bounds = array<i64: 64, 64>}, {pipeline_mode = #tpu.pipeline_mode<synchronous>, transform_indices = @transform_2, window_bounds = array<i64: 1, 64>}, {transform_indices = @transform_3, window_bounds = array<i64: 32, 64>}, {pipeline_mode = #tpu.pipeline_mode<synchronous>, transform_indices = @transform_4, window_bounds = array<i64: 1, 64>}, {pipeline_mode = #tpu.pipeline_mode<synchronous>, transform_indices = @transform_5, window_bounds = array<i64: 1, 64>}, {transform_indices = @transform_6, window_bounds = array<i64: 32, 64>}]} {
    %c0_i32 = arith.constant 0 : i32
    %0 = arith.cmpi eq, %arg1, %c0_i32 : i32
    %1 = arith.extui %0 : i1 to i32
    %c0_i32_0 = arith.constant 0 : i32
    %2 = arith.cmpi ne, %1, %c0_i32_0 : i32
    scf.if %2 {
      %cst_10 = arith.constant 0.000000e+00 : f32
      %12 = vector.broadcast %cst_10 : f32 to vector<32x64xf32>
      %c0_11 = arith.constant 0 : index
      %c0_12 = arith.constant 0 : index
      %13 = vector.load %arg9[%c0_11, %c0_12] : memref<32x64xf32, #tpu.memory_space<vmem>>, vector<32x64xf32>
      tpu.vector_store %arg9[%c0_11, %c0_12], %12 {strides = array<i32>} : memref<32x64xf32, #tpu.memory_space<vmem>>, vector<32x64xf32>,
    } else {
    }
    %c0 = arith.constant 0 : index
    %c0_1 = arith.constant 0 : index
    %3 = vector.load %arg9[%c0, %c0_1] : memref<32x64xf32, #tpu.memory_space<vmem>>, vector<32x64xf32>
    %c0_2 = arith.constant 0 : index
    %c0_3 = arith.constant 0 : index
    %4 = vector.load %arg2[%c0_2, %c0_3] : memref<32x64xbf16, #tpu.memory_space<vmem>>, vector<32x64xbf16>
    %c0_4 = arith.constant 0 : index
    %c0_5 = arith.constant 0 : index
    %5 = vector.load %arg3[%c0_4, %c0_5] : memref<64x64xbf16, #tpu.memory_space<vmem>>, vector<64x64xbf16>
    %cst = arith.constant dense<0.000000e+00> : vector<32x64xf32>
    %6 = tpu.matmul %4, %5, %cst {dimension_numbers = #tpu.dot_dimension_numbers<[1], [0], [0], [1], [0, 0, 1, 1], [], []>} : vector<32x64xbf16>, vector<64x64xbf16>, vector<32x64xf32> -> vector<32x64xf32>
    %7 = arith.addf %3, %6 : vector<32x64xf32>
    %c0_6 = arith.constant 0 : index
    %c0_7 = arith.constant 0 : index
    %8 = vector.load %arg9[%c0_6, %c0_7] : memref<32x64xf32, #tpu.memory_space<vmem>>, vector<32x64xf32>
    tpu.vector_store %arg9[%c0_6, %c0_7], %7 {strides = array<i32>} : memref<32x64xf32, #tpu.memory_space<vmem>>, vector<32x64xf32>,
    %c0_i32_8 = arith.constant 0 : i32
    %9 = arith.cmpi eq, %arg1, %c0_i32_8 : i32
    %10 = arith.extui %9 : i1 to i32
    %c0_i32_9 = arith.constant 0 : i32
    %11 = arith.cmpi ne, %10, %c0_i32_9 : i32
    scf.if %11 {
      %c0_10 = arith.constant 0 : index
      %c0_11 = arith.constant 0 : index
      %12 = vector.load %arg9[%c0_10, %c0_11] : memref<32x64xf32, #tpu.memory_space<vmem>>, vector<32x64xf32>
      %c0_12 = arith.constant 0 : index
      %c0_13 = arith.constant 0 : index
      %13 = vector.load %arg4[%c0_12, %c0_13] : memref<1x64xf32, #tpu.memory_space<vmem>>, vector<1x64xf32>
      %14 = vector.broadcast %13 : vector<1x64xf32> to vector<32x64xf32>
      %15 = arith.addf %12, %14 : vector<32x64xf32>
      %c0_14 = arith.constant 0 : index
      %c0_15 = arith.constant 0 : index
      %16 = vector.load %arg5[%c0_14, %c0_15] : memref<32x64xbf16, #tpu.memory_space<vmem>>, vector<32x64xbf16>
      %17 = arith.extf %16 : vector<32x64xbf16> to vector<32x64xf32>
      %18 = arith.addf %15, %17 : vector<32x64xf32>
      %cst_16 = arith.constant dense<0.000000e+00> : vector<32xf32>
      %19 = vector.multi_reduction <add>, %18, %cst_16 [1] : vector<32x64xf32> to vector<32xf32>
      %20 = vector.shape_cast %19 : vector<32xf32> to vector<32x1xf32>
      %cst_17 = arith.constant 6.400000e+01 : f32
      %21 = vector.broadcast %cst_17 : f32 to vector<32x1xf32>
      %22 = arith.divf %20, %21 : vector<32x1xf32>
      %23 = vector.broadcast %22 : vector<32x1xf32> to vector<32x64xf32>
      %24 = arith.subf %18, %23 : vector<32x64xf32>
      %25 = arith.mulf %24, %24 : vector<32x64xf32>
      %cst_18 = arith.constant dense<0.000000e+00> : vector<32xf32>
      %26 = vector.multi_reduction <add>, %25, %cst_18 [1] : vector<32x64xf32> to vector<32xf32>
      %27 = vector.shape_cast %26 : vector<32xf32> to vector<32x1xf32>
      %cst_19 = arith.constant 6.400000e+01 : f32
      %28 = vector.broadcast %cst_19 : f32 to vector<32x1xf32>
      %29 = arith.divf %27, %28 : vector<32x1xf32>
      %cst_20 = arith.constant 9.99999996E-13 : f32
      %30 = vector.broadcast %cst_20 : f32 to vector<32x1xf32>
      %31 = arith.addf %29, %30 : vector<32x1xf32>
      %32 = math.rsqrt %31 : vector<32x1xf32>
      %33 = vector.broadcast %22 : vector<32x1xf32> to vector<32x64xf32>
      %34 = arith.subf %18, %33 : vector<32x64xf32>
      %35 = vector.broadcast %32 : vector<32x1xf32> to vector<32x64xf32>
      %36 = arith.mulf %34, %35 : vector<32x64xf32>
      %c0_21 = arith.constant 0 : index
      %c0_22 = arith.constant 0 : index
      %37 = vector.load %arg6[%c0_21, %c0_22] : memref<1x64xf32, #tpu.memory_space<vmem>>, vector<1x64xf32>
      %38 = vector.broadcast %37 : vector<1x64xf32> to vector<32x64xf32>
      %39 = arith.mulf %36, %38 : vector<32x64xf32>
      %c0_23 = arith.constant 0 : index
      %c0_24 = arith.constant 0 : index
      %40 = vector.load %arg7[%c0_23, %c0_24] : memref<1x64xf32, #tpu.memory_space<vmem>>, vector<1x64xf32>
      %41 = vector.broadcast %40 : vector<1x64xf32> to vector<32x64xf32>
      %42 = arith.addf %39, %41 : vector<32x64xf32>
      %43 = arith.truncf %42 : vector<32x64xf32> to vector<32x64xbf16>
      %c0_25 = arith.constant 0 : index
      %c0_26 = arith.constant 0 : index
      %44 = vector.load %arg8[%c0_25, %c0_26] : memref<32x64xbf16, #tpu.memory_space<vmem>>, vector<32x64xbf16>
      tpu.vector_store %arg8[%c0_25, %c0_26], %43 {strides = array<i32>} : memref<32x64xbf16, #tpu.memory_space<vmem>>, vector<32x64xbf16>,
    } else {
    }
    return
  }
  func.func @transform_0(%arg0: i32, %arg1: i32) -> (i32, i32) {
    %c0_i32 = arith.constant 0 : i32
    return %arg0, %arg1 : i32, i32
  }
  func.func @transform_1(%arg0: i32, %arg1: i32) -> (i32, i32) {
    %c0_i32 = arith.constant 0 : i32
    %c0_i32_0 = arith.constant 0 : i32
    return %arg1, %c0_i32 : i32, i32
  }
  func.func @transform_2(%arg0: i32, %arg1: i32) -> (i32, i32) {
    %c0_i32 = arith.constant 0 : i32
    %c0_i32_0 = arith.constant 0 : i32
    %c0_i32_1 = arith.constant 0 : i32
    return %c0_i32, %c0_i32_0 : i32, i32
  }
  func.func @transform_3(%arg0: i32, %arg1: i32) -> (i32, i32) {
    %c0_i32 = arith.constant 0 : i32
    %c0_i32_0 = arith.constant 0 : i32
    return %arg0, %c0_i32 : i32, i32
  }
  func.func @transform_4(%arg0: i32, %arg1: i32) -> (i32, i32) {
    %c0_i32 = arith.constant 0 : i32
    %c0_i32_0 = arith.constant 0 : i32
    %c0_i32_1 = arith.constant 0 : i32
    return %c0_i32, %c0_i32_0 : i32, i32
  }
  func.func @transform_5(%arg0: i32, %arg1: i32) -> (i32, i32) {
    %c0_i32 = arith.constant 0 : i32
    %c0_i32_0 = arith.constant 0 : i32
    %c0_i32_1 = arith.constant 0 : i32
    return %c0_i32, %c0_i32_0 : i32, i32
  }
  func.func @transform_6(%arg0: i32, %arg1: i32) -> (i32, i32) {
    %c0_i32 = arith.constant 0 : i32
    %c0_i32_0 = arith.constant 0 : i32
    return %arg0, %c0_i32 : i32, i32
  }
}

module attributes {stable_mosaic.version = 11 : i64} {
  func.func @_attn_kernel(%arg0: i32, %arg1: i32, %arg2: memref<1x16x64xbf16, #tpu.memory_space<vmem>>, %arg3: memref<64x64xbf16, #tpu.memory_space<vmem>>, %arg4: memref<64x64xbf16, #tpu.memory_space<vmem>>, %arg5: memref<64x64xbf16, #tpu.memory_space<vmem>>, %arg6: memref<1x64xf32, #tpu.memory_space<vmem>>, %arg7: memref<1x64xf32, #tpu.memory_space<vmem>>, %arg8: memref<1x64xf32, #tpu.memory_space<vmem>>, %arg9: memref<1x1x16xf32, #tpu.memory_space<vmem>>, %arg10: memref<1x16x64xbf16, #tpu.memory_space<vmem>>, %arg11: memref<16x64xf32, #tpu.memory_space<vmem>>) attributes {dimension_semantics = [#tpu.dimension_semantics<parallel>, #tpu.dimension_semantics<parallel>], iteration_bounds = array<i64: 2, 1>, scalar_prefetch = 0 : i64, scratch_operands = 1 : i64, tpu.core_type = #tpu.core_type<tc>, window_params = [{transform_indices = @transform_0, window_bounds = array<i64: 1, 16, 64>}, {transform_indices = @transform_1, window_bounds = array<i64: 64, 64>}, {transform_indices = @transform_2, window_bounds = array<i64: 64, 64>}, {transform_indices = @transform_3, window_bounds = array<i64: 64, 64>}, {transform_indices = @transform_4, window_bounds = array<i64: 1, 64>}, {transform_indices = @transform_5, window_bounds = array<i64: 1, 64>}, {transform_indices = @transform_6, window_bounds = array<i64: 1, 64>}, {transform_indices = @transform_7, window_bounds = array<i64: 1, 1, 16>}, {transform_indices = @transform_8, window_bounds = array<i64: 1, 16, 64>}]} {
    %c0 = arith.constant 0 : index
    %c0_0 = arith.constant 0 : index
    %c0_1 = arith.constant 0 : index
    %0 = vector.load %arg2[%c0, %c0_0, %c0_1] : memref<1x16x64xbf16, #tpu.memory_space<vmem>>, vector<1x16x64xbf16>
    %1 = vector.shape_cast %0 : vector<1x16x64xbf16> to vector<16x64xbf16>
    %c0_2 = arith.constant 0 : index
    %c0_3 = arith.constant 0 : index
    %c0_4 = arith.constant 0 : index
    %2 = vector.load %arg9[%c0_2, %c0_3, %c0_4] : memref<1x1x16xf32, #tpu.memory_space<vmem>>, vector<1x1x16xf32>
    %3 = vector.shape_cast %2 : vector<1x1x16xf32> to vector<1x16xf32>
    %c0_5 = arith.constant 0 : index
    %c0_6 = arith.constant 0 : index
    %4 = vector.load %arg3[%c0_5, %c0_6] : memref<64x64xbf16, #tpu.memory_space<vmem>>, vector<64x64xbf16>
    %cst = arith.constant dense<0.000000e+00> : vector<16x64xf32>
    %5 = tpu.matmul %1, %4, %cst {dimension_numbers = #tpu.dot_dimension_numbers<[1], [0], [0], [1], [0, 0, 1, 1], [], []>} : vector<16x64xbf16>, vector<64x64xbf16>, vector<16x64xf32> -> vector<16x64xf32>
    %c0_7 = arith.constant 0 : index
    %c0_8 = arith.constant 0 : index
    %6 = vector.load %arg6[%c0_7, %c0_8] : memref<1x64xf32, #tpu.memory_space<vmem>>, vector<1x64xf32>
    %7 = vector.broadcast %6 : vector<1x64xf32> to vector<16x64xf32>
    %8 = arith.addf %5, %7 : vector<16x64xf32>
    %9 = arith.truncf %8 : vector<16x64xf32> to vector<16x64xbf16>
    %c0_9 = arith.constant 0 : index
    %c0_10 = arith.constant 0 : index
    %10 = vector.load %arg4[%c0_9, %c0_10] : memref<64x64xbf16, #tpu.memory_space<vmem>>, vector<64x64xbf16>
    %cst_11 = arith.constant dense<0.000000e+00> : vector<16x64xf32>
    %11 = tpu.matmul %1, %10, %cst_11 {dimension_numbers = #tpu.dot_dimension_numbers<[1], [0], [0], [1], [0, 0, 1, 1], [], []>} : vector<16x64xbf16>, vector<64x64xbf16>, vector<16x64xf32> -> vector<16x64xf32>
    %c0_12 = arith.constant 0 : index
    %c0_13 = arith.constant 0 : index
    %12 = vector.load %arg7[%c0_12, %c0_13] : memref<1x64xf32, #tpu.memory_space<vmem>>, vector<1x64xf32>
    %13 = vector.broadcast %12 : vector<1x64xf32> to vector<16x64xf32>
    %14 = arith.addf %11, %13 : vector<16x64xf32>
    %15 = arith.truncf %14 : vector<16x64xf32> to vector<16x64xbf16>
    %c0_14 = arith.constant 0 : index
    %c0_15 = arith.constant 0 : index
    %16 = vector.load %arg5[%c0_14, %c0_15] : memref<64x64xbf16, #tpu.memory_space<vmem>>, vector<64x64xbf16>
    %cst_16 = arith.constant dense<0.000000e+00> : vector<16x64xf32>
    %17 = tpu.matmul %1, %16, %cst_16 {dimension_numbers = #tpu.dot_dimension_numbers<[1], [0], [0], [1], [0, 0, 1, 1], [], []>} : vector<16x64xbf16>, vector<64x64xbf16>, vector<16x64xf32> -> vector<16x64xf32>
    %c0_17 = arith.constant 0 : index
    %c0_18 = arith.constant 0 : index
    %18 = vector.load %arg8[%c0_17, %c0_18] : memref<1x64xf32, #tpu.memory_space<vmem>>, vector<1x64xf32>
    %19 = vector.broadcast %18 : vector<1x64xf32> to vector<16x64xf32>
    %20 = arith.addf %17, %19 : vector<16x64xf32>
    %21 = arith.truncf %20 : vector<16x64xf32> to vector<16x64xbf16>
    %22 = vector.extract_strided_slice %9 {offsets = [0, 0], sizes = [16, 32], strides = [1, 1]} : vector<16x64xbf16> to vector<16x32xbf16>
    %23 = vector.extract_strided_slice %15 {offsets = [0, 0], sizes = [16, 32], strides = [1, 1]} : vector<16x64xbf16> to vector<16x32xbf16>
    %cst_19 = arith.constant dense<0.000000e+00> : vector<16x16xf32>
    %24 = tpu.matmul %22, %23, %cst_19 {dimension_numbers = #tpu.dot_dimension_numbers<[1], [1], [0], [0], [0, 0, 1, 0], [], []>} : vector<16x32xbf16>, vector<16x32xbf16>, vector<16x16xf32> -> vector<16x16xf32>
    %cst_20 = arith.constant 0.176776692 : f32
    %25 = vector.broadcast %cst_20 : f32 to vector<16x16xf32>
    %26 = arith.mulf %24, %25 : vector<16x16xf32>
    %27 = vector.broadcast %3 : vector<1x16xf32> to vector<16x16xf32>
    %28 = arith.addf %26, %27 : vector<16x16xf32>
    %cst_21 = arith.constant dense<0xFF800000> : vector<16xf32>
    %29 = vector.multi_reduction <maximumf>, %28, %cst_21 [1] : vector<16x16xf32> to vector<16xf32>
    %30 = vector.shape_cast %29 : vector<16xf32> to vector<16x1xf32>
    %31 = vector.broadcast %30 : vector<16x1xf32> to vector<16x16xf32>
    %32 = arith.subf %28, %31 : vector<16x16xf32>
    %33 = math.exp %32 : vector<16x16xf32>
    %cst_22 = arith.constant dense<0.000000e+00> : vector<16xf32>
    %34 = vector.multi_reduction <add>, %33, %cst_22 [1] : vector<16x16xf32> to vector<16xf32>
    %35 = vector.shape_cast %34 : vector<16xf32> to vector<16x1xf32>
    %36 = tpu.reciprocal %35 {approx = true} : vector<16x1xf32> -> vector<16x1xf32>
    %37 = vector.broadcast %36 : vector<16x1xf32> to vector<16x16xf32>
    %38 = arith.mulf %33, %37 : vector<16x16xf32>
    %39 = arith.truncf %38 : vector<16x16xf32> to vector<16x16xbf16>
    %40 = vector.extract_strided_slice %21 {offsets = [0, 0], sizes = [16, 32], strides = [1, 1]} : vector<16x64xbf16> to vector<16x32xbf16>
    %cst_23 = arith.constant dense<0.000000e+00> : vector<16x32xf32>
    %41 = tpu.matmul %39, %40, %cst_23 {dimension_numbers = #tpu.dot_dimension_numbers<[1], [0], [0], [1], [0, 0, 1, 1], [], []>} : vector<16x16xbf16>, vector<16x32xbf16>, vector<16x32xf32> -> vector<16x32xf32>
    %c0_24 = arith.constant 0 : index
    %c0_25 = arith.constant 0 : index
    %42 = vector.load %arg11[%c0_24, %c0_25] : memref<16x64xf32, #tpu.memory_space<vmem>>, vector<16x32xf32>
    tpu.vector_store %arg11[%c0_24, %c0_25], %41 {strides = array<i32>} : memref<16x64xf32, #tpu.memory_space<vmem>>, vector<16x32xf32>,
    %43 = vector.extract_strided_slice %9 {offsets = [0, 32], sizes = [16, 32], strides = [1, 1]} : vector<16x64xbf16> to vector<16x32xbf16>
    %44 = vector.extract_strided_slice %15 {offsets = [0, 32], sizes = [16, 32], strides = [1, 1]} : vector<16x64xbf16> to vector<16x32xbf16>
    %cst_26 = arith.constant dense<0.000000e+00> : vector<16x16xf32>
    %45 = tpu.matmul %43, %44, %cst_26 {dimension_numbers = #tpu.dot_dimension_numbers<[1], [1], [0], [0], [0, 0, 1, 0], [], []>} : vector<16x32xbf16>, vector<16x32xbf16>, vector<16x16xf32> -> vector<16x16xf32>
    %cst_27 = arith.constant 0.176776692 : f32
    %46 = vector.broadcast %cst_27 : f32 to vector<16x16xf32>
    %47 = arith.mulf %45, %46 : vector<16x16xf32>
    %48 = vector.broadcast %3 : vector<1x16xf32> to vector<16x16xf32>
    %49 = arith.addf %47, %48 : vector<16x16xf32>
    %cst_28 = arith.constant dense<0xFF800000> : vector<16xf32>
    %50 = vector.multi_reduction <maximumf>, %49, %cst_28 [1] : vector<16x16xf32> to vector<16xf32>
    %51 = vector.shape_cast %50 : vector<16xf32> to vector<16x1xf32>
    %52 = vector.broadcast %51 : vector<16x1xf32> to vector<16x16xf32>
    %53 = arith.subf %49, %52 : vector<16x16xf32>
    %54 = math.exp %53 : vector<16x16xf32>
    %cst_29 = arith.constant dense<0.000000e+00> : vector<16xf32>
    %55 = vector.multi_reduction <add>, %54, %cst_29 [1] : vector<16x16xf32> to vector<16xf32>
    %56 = vector.shape_cast %55 : vector<16xf32> to vector<16x1xf32>
    %57 = tpu.reciprocal %56 {approx = true} : vector<16x1xf32> -> vector<16x1xf32>
    %58 = vector.broadcast %57 : vector<16x1xf32> to vector<16x16xf32>
    %59 = arith.mulf %54, %58 : vector<16x16xf32>
    %60 = arith.truncf %59 : vector<16x16xf32> to vector<16x16xbf16>
    %61 = vector.extract_strided_slice %21 {offsets = [0, 32], sizes = [16, 32], strides = [1, 1]} : vector<16x64xbf16> to vector<16x32xbf16>
    %cst_30 = arith.constant dense<0.000000e+00> : vector<16x32xf32>
    %62 = tpu.matmul %60, %61, %cst_30 {dimension_numbers = #tpu.dot_dimension_numbers<[1], [0], [0], [1], [0, 0, 1, 1], [], []>} : vector<16x16xbf16>, vector<16x32xbf16>, vector<16x32xf32> -> vector<16x32xf32>
    %c0_31 = arith.constant 0 : index
    %c32 = arith.constant 32 : index
    %63 = vector.load %arg11[%c0_31, %c32] : memref<16x64xf32, #tpu.memory_space<vmem>>, vector<16x32xf32>
    tpu.vector_store %arg11[%c0_31, %c32], %62 {strides = array<i32>} : memref<16x64xf32, #tpu.memory_space<vmem>>, vector<16x32xf32>,
    %c0_32 = arith.constant 0 : index
    %c0_33 = arith.constant 0 : index
    %64 = vector.load %arg11[%c0_32, %c0_33] : memref<16x64xf32, #tpu.memory_space<vmem>>, vector<16x64xf32>
    %65 = arith.truncf %64 : vector<16x64xf32> to vector<16x64xbf16>
    %c0_34 = arith.constant 0 : index
    %c0_35 = arith.constant 0 : index
    %c0_36 = arith.constant 0 : index
    %66 = vector.load %arg10[%c0_34, %c0_35, %c0_36] : memref<1x16x64xbf16, #tpu.memory_space<vmem>>, vector<1x16x64xbf16>
    %67 = vector.shape_cast %66 : vector<1x16x64xbf16> to vector<16x64xbf16>
    %68 = vector.shape_cast %65 : vector<16x64xbf16> to vector<1x16x64xbf16>
    tpu.vector_store %arg10[%c0_34, %c0_35, %c0_36], %68 {strides = array<i32>} : memref<1x16x64xbf16, #tpu.memory_space<vmem>>, vector<1x16x64xbf16>,
    return
  }
  func.func @transform_0(%arg0: i32, %arg1: i32) -> (i32, i32, i32) {
    %c0_i32 = arith.constant 0 : i32
    %c0_i32_0 = arith.constant 0 : i32
    %c0_i32_1 = arith.constant 0 : i32
    return %arg0, %c0_i32, %c0_i32_0 : i32, i32, i32
  }
  func.func @transform_1(%arg0: i32, %arg1: i32) -> (i32, i32) {
    %c0_i32 = arith.constant 0 : i32
    %c0_i32_0 = arith.constant 0 : i32
    return %c0_i32, %arg1 : i32, i32
  }
  func.func @transform_2(%arg0: i32, %arg1: i32) -> (i32, i32) {
    %c0_i32 = arith.constant 0 : i32
    %c0_i32_0 = arith.constant 0 : i32
    return %c0_i32, %arg1 : i32, i32
  }
  func.func @transform_3(%arg0: i32, %arg1: i32) -> (i32, i32) {
    %c0_i32 = arith.constant 0 : i32
    %c0_i32_0 = arith.constant 0 : i32
    return %c0_i32, %arg1 : i32, i32
  }
  func.func @transform_4(%arg0: i32, %arg1: i32) -> (i32, i32) {
    %c0_i32 = arith.constant 0 : i32
    %c0_i32_0 = arith.constant 0 : i32
    return %c0_i32, %arg1 : i32, i32
  }
  func.func @transform_5(%arg0: i32, %arg1: i32) -> (i32, i32) {
    %c0_i32 = arith.constant 0 : i32
    %c0_i32_0 = arith.constant 0 : i32
    return %c0_i32, %arg1 : i32, i32
  }
  func.func @transform_6(%arg0: i32, %arg1: i32) -> (i32, i32) {
    %c0_i32 = arith.constant 0 : i32
    %c0_i32_0 = arith.constant 0 : i32
    return %c0_i32, %arg1 : i32, i32
  }
  func.func @transform_7(%arg0: i32, %arg1: i32) -> (i32, i32, i32) {
    %c0_i32 = arith.constant 0 : i32
    %c0_i32_0 = arith.constant 0 : i32
    %c0_i32_1 = arith.constant 0 : i32
    return %arg0, %c0_i32, %c0_i32_0 : i32, i32, i32
  }
  func.func @transform_8(%arg0: i32, %arg1: i32) -> (i32, i32, i32) {
    %c0_i32 = arith.constant 0 : i32
    %c0_i32_0 = arith.constant 0 : i32
    return %arg0, %c0_i32, %arg1 : i32, i32, i32
  }
}

module attributes {stable_mosaic.version = 11 : i64} {
  func.func @_ffn_ln_kernel(%arg0: i32, %arg1: i32, %arg2: memref<32x64xbf16, #tpu.memory_space<vmem>>, %arg3: memref<64x128xbf16, #tpu.memory_space<vmem>>, %arg4: memref<1x128xf32, #tpu.memory_space<vmem>>, %arg5: memref<128x64xbf16, #tpu.memory_space<vmem>>, %arg6: memref<1x64xf32, #tpu.memory_space<vmem>>, %arg7: memref<1x64xf32, #tpu.memory_space<vmem>>, %arg8: memref<1x64xf32, #tpu.memory_space<vmem>>, %arg9: memref<32x64xbf16, #tpu.memory_space<vmem>>, %arg10: memref<32x64xf32, #tpu.memory_space<vmem>>) attributes {dimension_semantics = [#tpu.dimension_semantics<parallel>, #tpu.dimension_semantics<arbitrary>], iteration_bounds = array<i64: 1, 1>, scalar_prefetch = 0 : i64, scratch_operands = 1 : i64, tpu.core_type = #tpu.core_type<tc>, window_params = [{transform_indices = @transform_0, window_bounds = array<i64: 32, 64>}, {transform_indices = @transform_1, window_bounds = array<i64: 64, 128>}, {transform_indices = @transform_2, window_bounds = array<i64: 1, 128>}, {transform_indices = @transform_3, window_bounds = array<i64: 128, 64>}, {pipeline_mode = #tpu.pipeline_mode<synchronous>, transform_indices = @transform_4, window_bounds = array<i64: 1, 64>}, {pipeline_mode = #tpu.pipeline_mode<synchronous>, transform_indices = @transform_5, window_bounds = array<i64: 1, 64>}, {pipeline_mode = #tpu.pipeline_mode<synchronous>, transform_indices = @transform_6, window_bounds = array<i64: 1, 64>}, {transform_indices = @transform_7, window_bounds = array<i64: 32, 64>}]} {
    %c0_i32 = arith.constant 0 : i32
    %0 = arith.cmpi eq, %arg1, %c0_i32 : i32
    %1 = arith.extui %0 : i1 to i32
    %c0_i32_0 = arith.constant 0 : i32
    %2 = arith.cmpi ne, %1, %c0_i32_0 : i32
    scf.if %2 {
      %cst_19 = arith.constant 0.000000e+00 : f32
      %31 = vector.broadcast %cst_19 : f32 to vector<32x64xf32>
      %c0_20 = arith.constant 0 : index
      %c0_21 = arith.constant 0 : index
      %32 = vector.load %arg10[%c0_20, %c0_21] : memref<32x64xf32, #tpu.memory_space<vmem>>, vector<32x64xf32>
      tpu.vector_store %arg10[%c0_20, %c0_21], %31 {strides = array<i32>} : memref<32x64xf32, #tpu.memory_space<vmem>>, vector<32x64xf32>,
    } else {
    }
    %c0 = arith.constant 0 : index
    %c0_1 = arith.constant 0 : index
    %3 = vector.load %arg2[%c0, %c0_1] : memref<32x64xbf16, #tpu.memory_space<vmem>>, vector<32x64xbf16>
    %c0_2 = arith.constant 0 : index
    %c0_3 = arith.constant 0 : index
    %4 = vector.load %arg3[%c0_2, %c0_3] : memref<64x128xbf16, #tpu.memory_space<vmem>>, vector<64x128xbf16>
    %cst = arith.constant dense<0.000000e+00> : vector<32x128xf32>
    %5 = tpu.matmul %3, %4, %cst {dimension_numbers = #tpu.dot_dimension_numbers<[1], [0], [0], [1], [0, 0, 1, 1], [], []>} : vector<32x64xbf16>, vector<64x128xbf16>, vector<32x128xf32> -> vector<32x128xf32>
    %c0_4 = arith.constant 0 : index
    %c0_5 = arith.constant 0 : index
    %6 = vector.load %arg4[%c0_4, %c0_5] : memref<1x128xf32, #tpu.memory_space<vmem>>, vector<1x128xf32>
    %7 = vector.broadcast %6 : vector<1x128xf32> to vector<32x128xf32>
    %8 = arith.addf %5, %7 : vector<32x128xf32>
    %9 = arith.mulf %8, %8 : vector<32x128xf32>
    %10 = arith.mulf %8, %9 : vector<32x128xf32>
    %cst_6 = arith.constant 4.471500e-02 : f32
    %11 = vector.broadcast %cst_6 : f32 to vector<32x128xf32>
    %12 = arith.mulf %11, %10 : vector<32x128xf32>
    %13 = arith.addf %8, %12 : vector<32x128xf32>
    %cst_7 = arith.constant 0.797884583 : f32
    %14 = vector.broadcast %cst_7 : f32 to vector<32x128xf32>
    %15 = arith.mulf %14, %13 : vector<32x128xf32>
    %16 = math.tanh %15 : vector<32x128xf32>
    %cst_8 = arith.constant 1.000000e+00 : f32
    %17 = vector.broadcast %cst_8 : f32 to vector<32x128xf32>
    %18 = arith.addf %17, %16 : vector<32x128xf32>
    %cst_9 = arith.constant 5.000000e-01 : f32
    %19 = vector.broadcast %cst_9 : f32 to vector<32x128xf32>
    %20 = arith.mulf %19, %18 : vector<32x128xf32>
    %21 = arith.mulf %8, %20 : vector<32x128xf32>
    %22 = arith.truncf %21 : vector<32x128xf32> to vector<32x128xbf16>
    %c0_10 = arith.constant 0 : index
    %c0_11 = arith.constant 0 : index
    %23 = vector.load %arg10[%c0_10, %c0_11] : memref<32x64xf32, #tpu.memory_space<vmem>>, vector<32x64xf32>
    %c0_12 = arith.constant 0 : index
    %c0_13 = arith.constant 0 : index
    %24 = vector.load %arg5[%c0_12, %c0_13] : memref<128x64xbf16, #tpu.memory_space<vmem>>, vector<128x64xbf16>
    %cst_14 = arith.constant dense<0.000000e+00> : vector<32x64xf32>
    %25 = tpu.matmul %22, %24, %cst_14 {dimension_numbers = #tpu.dot_dimension_numbers<[1], [0], [0], [1], [0, 0, 1, 1], [], []>} : vector<32x128xbf16>, vector<128x64xbf16>, vector<32x64xf32> -> vector<32x64xf32>
    %26 = arith.addf %23, %25 : vector<32x64xf32>
    %c0_15 = arith.constant 0 : index
    %c0_16 = arith.constant 0 : index
    %27 = vector.load %arg10[%c0_15, %c0_16] : memref<32x64xf32, #tpu.memory_space<vmem>>, vector<32x64xf32>
    tpu.vector_store %arg10[%c0_15, %c0_16], %26 {strides = array<i32>} : memref<32x64xf32, #tpu.memory_space<vmem>>, vector<32x64xf32>,
    %c0_i32_17 = arith.constant 0 : i32
    %28 = arith.cmpi eq, %arg1, %c0_i32_17 : i32
    %29 = arith.extui %28 : i1 to i32
    %c0_i32_18 = arith.constant 0 : i32
    %30 = arith.cmpi ne, %29, %c0_i32_18 : i32
    scf.if %30 {
      %c0_19 = arith.constant 0 : index
      %c0_20 = arith.constant 0 : index
      %31 = vector.load %arg10[%c0_19, %c0_20] : memref<32x64xf32, #tpu.memory_space<vmem>>, vector<32x64xf32>
      %c0_21 = arith.constant 0 : index
      %c0_22 = arith.constant 0 : index
      %32 = vector.load %arg6[%c0_21, %c0_22] : memref<1x64xf32, #tpu.memory_space<vmem>>, vector<1x64xf32>
      %33 = vector.broadcast %32 : vector<1x64xf32> to vector<32x64xf32>
      %34 = arith.addf %31, %33 : vector<32x64xf32>
      %c0_23 = arith.constant 0 : index
      %c0_24 = arith.constant 0 : index
      %35 = vector.load %arg2[%c0_23, %c0_24] : memref<32x64xbf16, #tpu.memory_space<vmem>>, vector<32x64xbf16>
      %36 = arith.extf %35 : vector<32x64xbf16> to vector<32x64xf32>
      %37 = arith.addf %34, %36 : vector<32x64xf32>
      %cst_25 = arith.constant dense<0.000000e+00> : vector<32xf32>
      %38 = vector.multi_reduction <add>, %37, %cst_25 [1] : vector<32x64xf32> to vector<32xf32>
      %39 = vector.shape_cast %38 : vector<32xf32> to vector<32x1xf32>
      %cst_26 = arith.constant 6.400000e+01 : f32
      %40 = vector.broadcast %cst_26 : f32 to vector<32x1xf32>
      %41 = arith.divf %39, %40 : vector<32x1xf32>
      %42 = vector.broadcast %41 : vector<32x1xf32> to vector<32x64xf32>
      %43 = arith.subf %37, %42 : vector<32x64xf32>
      %44 = arith.mulf %43, %43 : vector<32x64xf32>
      %cst_27 = arith.constant dense<0.000000e+00> : vector<32xf32>
      %45 = vector.multi_reduction <add>, %44, %cst_27 [1] : vector<32x64xf32> to vector<32xf32>
      %46 = vector.shape_cast %45 : vector<32xf32> to vector<32x1xf32>
      %cst_28 = arith.constant 6.400000e+01 : f32
      %47 = vector.broadcast %cst_28 : f32 to vector<32x1xf32>
      %48 = arith.divf %46, %47 : vector<32x1xf32>
      %cst_29 = arith.constant 9.99999996E-13 : f32
      %49 = vector.broadcast %cst_29 : f32 to vector<32x1xf32>
      %50 = arith.addf %48, %49 : vector<32x1xf32>
      %51 = math.rsqrt %50 : vector<32x1xf32>
      %52 = vector.broadcast %41 : vector<32x1xf32> to vector<32x64xf32>
      %53 = arith.subf %37, %52 : vector<32x64xf32>
      %54 = vector.broadcast %51 : vector<32x1xf32> to vector<32x64xf32>
      %55 = arith.mulf %53, %54 : vector<32x64xf32>
      %c0_30 = arith.constant 0 : index
      %c0_31 = arith.constant 0 : index
      %56 = vector.load %arg7[%c0_30, %c0_31] : memref<1x64xf32, #tpu.memory_space<vmem>>, vector<1x64xf32>
      %57 = vector.broadcast %56 : vector<1x64xf32> to vector<32x64xf32>
      %58 = arith.mulf %55, %57 : vector<32x64xf32>
      %c0_32 = arith.constant 0 : index
      %c0_33 = arith.constant 0 : index
      %59 = vector.load %arg8[%c0_32, %c0_33] : memref<1x64xf32, #tpu.memory_space<vmem>>, vector<1x64xf32>
      %60 = vector.broadcast %59 : vector<1x64xf32> to vector<32x64xf32>
      %61 = arith.addf %58, %60 : vector<32x64xf32>
      %62 = arith.truncf %61 : vector<32x64xf32> to vector<32x64xbf16>
      %c0_34 = arith.constant 0 : index
      %c0_35 = arith.constant 0 : index
      %63 = vector.load %arg9[%c0_34, %c0_35] : memref<32x64xbf16, #tpu.memory_space<vmem>>, vector<32x64xbf16>
      tpu.vector_store %arg9[%c0_34, %c0_35], %62 {strides = array<i32>} : memref<32x64xbf16, #tpu.memory_space<vmem>>, vector<32x64xbf16>,
    } else {
    }
    return
  }
  func.func @transform_0(%arg0: i32, %arg1: i32) -> (i32, i32) {
    %c0_i32 = arith.constant 0 : i32
    %c0_i32_0 = arith.constant 0 : i32
    return %arg0, %c0_i32 : i32, i32
  }
  func.func @transform_1(%arg0: i32, %arg1: i32) -> (i32, i32) {
    %c0_i32 = arith.constant 0 : i32
    %c0_i32_0 = arith.constant 0 : i32
    return %c0_i32, %arg1 : i32, i32
  }
  func.func @transform_2(%arg0: i32, %arg1: i32) -> (i32, i32) {
    %c0_i32 = arith.constant 0 : i32
    %c0_i32_0 = arith.constant 0 : i32
    return %c0_i32, %arg1 : i32, i32
  }
  func.func @transform_3(%arg0: i32, %arg1: i32) -> (i32, i32) {
    %c0_i32 = arith.constant 0 : i32
    %c0_i32_0 = arith.constant 0 : i32
    return %arg1, %c0_i32 : i32, i32
  }
  func.func @transform_4(%arg0: i32, %arg1: i32) -> (i32, i32) {
    %c0_i32 = arith.constant 0 : i32
    %c0_i32_0 = arith.constant 0 : i32
    %c0_i32_1 = arith.constant 0 : i32
    return %c0_i32, %c0_i32_0 : i32, i32
  }
  func.func @transform_5(%arg0: i32, %arg1: i32) -> (i32, i32) {
    %c0_i32 = arith.constant 0 : i32
    %c0_i32_0 = arith.constant 0 : i32
    %c0_i32_1 = arith.constant 0 : i32
    return %c0_i32, %c0_i32_0 : i32, i32
  }
  func.func @transform_6(%arg0: i32, %arg1: i32) -> (i32, i32) {
    %c0_i32 = arith.constant 0 : i32
    %c0_i32_0 = arith.constant 0 : i32
    %c0_i32_1 = arith.constant 0 : i32
    return %c0_i32, %c0_i32_0 : i32, i32
  }
  func.func @transform_7(%arg0: i32, %arg1: i32) -> (i32, i32) {
    %c0_i32 = arith.constant 0 : i32
    %c0_i32_0 = arith.constant 0 : i32
    return %arg0, %c0_i32 : i32, i32
  }
}

</mosaic_0001>

<bundles_post_ra>
// kernel: bert_forward.7
= control target key start
LH: loop header
LB: loop body
LE: loop exit
PB: predicated region body
PF: predicated region fallthrough
CT: control target
= control target key end

     0   :  { %vm22_vm0 = vcmask 523264   ;;  %vm114_vm1 = vcmask 519168   ;;  %s206_s0 = inlined_call_operand.vmem [shape: bf16[32,64], index: 0, kind: input, shape index: {}]   ;;  %s207_s1 = inlined_call_operand.vmem [shape: f32[1,64], index: 1, kind: input, shape index: {}]   ;;  %s208_s2 = inlined_call_operand.vmem [shape: f32[1,64], index: 2, kind: input, shape index: {}]   ;;  %s209_s3 = inlined_call_operand.vmem [shape: bf16[32,64], index: 3, kind: output, shape index: {}]  }
   0x1   :  { %v134_v0 = vld [vmem:[%s206_s0] sm:$0xff]   ;;  %v141_v1 = vld [vmem:[%s206_s0 + $0x8] sm:$0xff]  }
   0x2   :  { %v135_v2 = vunpack.c.l.bf16 %v134_v0  ;;  %v139_v3 = vunpack.c.l.bf16 %v141_v1  ;;  %v136_v4 = vunpack.c.h.bf16 %v134_v0  ;;  %v140_v5 = vunpack.c.h.bf16 %v141_v1  ;;  %v123_v43 = vld [vmem:[%s207_s1] ss:$0 sm:$0xff] }
   0x3   :  { %v124_v45 = vld [vmem:[%s208_s2] ss:$0 sm:$0xff] }
   0x4   :  { %v23_v6 = vsel %vm22_vm0, %v135_v2, 0.0  ;;  %v29_v7 = vsel %vm22_vm0, %v139_v3, 0.0  ;;  %v26_v8 = vsel %vm22_vm0, %v136_v4, 0.0  ;;  %v32_v9 = vsel %vm22_vm0, %v140_v5, 0.0 }
   0x5   :  { %24 = vadd.xlane.f32.xlu0 %v23_v6  ;;  %30 = vadd.xlane.f32.xlu1 %v29_v7 }
   0x9   :  { %27 = vadd.xlane.f32.xlu0 %v26_v8  ;;  %33 = vadd.xlane.f32.xlu1 %v32_v9 }
  0x92   :  { %v25_v10 = vpop.xlane.xlu0 %24  ;;  %v31_v11 = vpop.xlane.xlu1 %30 }
  0x93   :  { %v36_v12 = vmul.f32 0.015625, %v25_v10  ;;  %v38_v13 = vmul.f32 0.015625, %v31_v11 }
  0x95   :  { %v40_v14 = vsub.f32 %v135_v2, %v36_v12  ;;  %v42_v15 = vsub.f32 %v139_v3, %v38_v13 }
  0x96   :  { %v28_v16 = vpop.xlane.xlu0 %27  ;;  %v34_v17 = vpop.xlane.xlu1 %33 }
  0x97   :  { %v37_v18 = vmul.f32 0.015625, %v28_v16  ;;  %v39_v19 = vmul.f32 0.015625, %v34_v17  ;;  %v44_v20 = vmul.f32 %v40_v14, %v40_v14  ;;  %v46_v21 = vmul.f32 %v42_v15, %v42_v15 }
  0x99   :  { %v41_v22 = vsub.f32 %v136_v4, %v37_v18  ;;  %v43_v23 = vsub.f32 %v140_v5, %v39_v19  ;;  %v48_v24 = vsel %vm22_vm0, %v44_v20, 0.0  ;;  %v54_v25 = vsel %vm22_vm0, %v46_v21, 0.0 }
  0x9a   :  { %49 = vadd.xlane.f32.xlu0 %v48_v24 }
  0x9b   :  { %v45_v26 = vmul.f32 %v41_v22, %v41_v22  ;;  %v47_v27 = vmul.f32 %v43_v23, %v43_v23 }
  0x9d   :  { %v51_v28 = vsel %vm22_vm0, %v45_v26, 0.0  ;;  %v57_v29 = vsel %vm22_vm0, %v47_v27, 0.0 }
  0x9e   :  { %55 = vadd.xlane.f32.xlu0 %v54_v25  ;;  %52 = vadd.xlane.f32.xlu1 %v51_v28 }
  0xa2   :  { %58 = vadd.xlane.f32.xlu1 %v57_v29 }
 0x127   :  { %v50_v30 = vpop.xlane.xlu0 %49 }
 0x128   :  { %v60_v31 = vmul.f32 0.015625, %v50_v30 }
 0x12a   :  { %v64_v32 = vadd.f32 1e-12, %v60_v31 }
 0x12b   :  { %v53_v33 = vpop.xlane.xlu1 %52  ;;  %v56_v34 = vpop.xlane.xlu0 %55 }
 0x12c   :  { %142 = vrsqrt.f32 %v64_v32  ;;  %v61_v35 = vmul.f32 0.015625, %v53_v33  ;;  %v62_v36 = vmul.f32 0.015625, %v56_v34 }
 0x12e   :  { %v65_v37 = vadd.f32 1e-12, %v61_v35  ;;  %v66_v38 = vadd.f32 1e-12, %v62_v36 }
 0x12f   :  { %v59_v39 = vpop.xlane.xlu1 %58 }
 0x130   :  { %144 = vrsqrt.f32 %v65_v37  ;;  %v63_v40 = vmul.f32 0.015625, %v59_v39 }
 0x131   :  { %146 = vrsqrt.f32 %v66_v38 }
 0x132   :  { %v67_v41 = vadd.f32 1e-12, %v63_v40 }
 0x134   :  { %148 = vrsqrt.f32 %v67_v41 }
 0x136   :  { %v143_v42 = vpop.eup %142 }
 0x137   :  { %v72_v44 = vmul.f32 %v143_v42, %v40_v14 }
 0x139   :  { %v83_v46 = vmul.f32 %v123_v43, %v72_v44 }
 0x13a   :  { %v145_v47 = vpop.eup %144 }
 0x13b   :  { %v147_v48 = vpop.eup %146  ;;  %v94_v49 = vadd.f32 %v124_v45, %v83_v46  ;;  %v73_v50 = vmul.f32 %v145_v47, %v41_v22 }
 0x13c   :  { %v74_v51 = vmul.f32 %v147_v48, %v42_v15 }
 0x13d   :  { %v129_v52 = vpack.c.bf16 %v94_v49, %v94_v49  ;;  %v84_v53 = vmul.f32 %v123_v43, %v73_v50 }
 0x13e   :  { %v149_v54 = vpop.eup %148  ;;  %v85_v55 = vmul.f32 %v123_v43, %v74_v51 }
 0x13f   :  { %115 = vst.msk [vmem:[%s209_s3] sm:$0xf] %vm114_vm1, %v129_v52  ;;  %v95_v56 = vadd.f32 %v124_v45, %v84_v53  ;;  %v75_v57 = vmul.f32 %v149_v54, %v43_v23 }
 0x140   :  { %v96_v58 = vadd.f32 %v124_v45, %v85_v55 }
 0x141   :  { %v130_v59 = vpack.c.bf16 %v95_v56, %v95_v56  ;;  %v86_v60 = vmul.f32 %v123_v43, %v75_v57 }
 0x142   :  { %v131_v61 = vpack.c.bf16 %v96_v58, %v96_v58 }
 0x143   :  { %116 = vst.msk [vmem:[%s209_s3 + $0x4] sm:$0xf] %vm114_vm1, %v130_v59  ;;  %v97_v62 = vadd.f32 %v124_v45, %v86_v60 }
 0x144   :  { %117 = vst.msk [vmem:[%s209_s3 + $0x8] sm:$0xf] %vm114_vm1, %v131_v61 }
 0x145   :  { %v132_v63 = vpack.c.bf16 %v97_v62, %v97_v62 }
 0x147   :  { %118 = vst.msk [vmem:[%s209_s3 + $0xc] sm:$0xf] %vm114_vm1, %v132_v63 }

// kernel: bert_forward.9
= control target key start
LH: loop header
LB: loop body
LE: loop exit
PB: predicated region body
PF: predicated region fallthrough
CT: control target
= control target key end

     0   :  { %vm28_vm0 = vcmask 523264   ;;  %v338_v1 = vmov 0.0   ;;  %vm268_vm1 = vcmask 519168   ;;  %s441_s1 = inlined_call_operand.vmem [shape: bf16[64,64], index: 1, kind: input, shape index: {}]   ;;  %s442_s0 = inlined_call_operand.vmem [shape: bf16[32,64], index: 0, kind: input, shape index: {}]   ;;  %s443_s3 = inlined_call_operand.vmem [shape: bf16[32,64], index: 3, kind: input, shape index: {}]   ;;  %s444_s2 = inlined_call_operand.vmem [shape: f32[1,64], index: 2, kind: input, shape index: {}]   ;;  %s445_s4 = inlined_call_operand.vmem [shape: f32[1,64], index: 4, kind: input, shape index: {}]   ;;  %s446_s5 = inlined_call_operand.vmem [shape: f32[1,64], index: 5, kind: input, shape index: {}]   ;;  %s447_s6 = inlined_call_operand.vmem [shape: bf16[32,64], index: 6, kind: output, shape index: {}]  }
   0x1   :  { %v324_v0 = vld [vmem:[%s441_s1] sm:$0xff]   ;;  %31 = vst.msk [vmem:[#allocation2 + $0x10] sm:$0xff] %vm28_vm0, %v338_v1  ;;  %29 = vst.msk [vmem:[#allocation2] sm:$0xff] %vm28_vm0, %v338_v1  ;;  %v325_v2 = vld [vmem:[%s441_s1 + $0x8] sm:$0xff]  }
   0x2   :  { %30 = vst.msk [vmem:[#allocation2 + $0x8] sm:$0xff] %vm28_vm0, %v338_v1  ;;  %32 = vst.msk [vmem:[#allocation2 + $0x18] sm:$0xff] %vm28_vm0, %v338_v1  ;;  %311 = vmatprep.subr.bf16.mxu0 %v324_v0  ;;  %v326_v3 = vld [vmem:[%s441_s1 + $0x10] sm:$0xff]   ;;  %v328_v4 = vld [vmem:[%s442_s0] sm:$0xff]  }
   0x3   :  { %312 = vmatpush3.bf16.msra.mxu0 %v324_v0  ;;  %319 = vmatprep.mubr.msk.bf16.mxu0 %vm28_vm0, %v328_v4  ;;  %v327_v5 = vld [vmem:[%s441_s1 + $0x18] sm:$0xff]   ;;  %v329_v6 = vld [vmem:[%s442_s0 + $0x8] sm:$0xff]   ;;  %v297_v20 = vld [vmem:[%s443_s3] sm:$0xff]  }
   0x4   :  { %313 = vmatprep.subr.bf16.mxu0 %v325_v2  ;;  %v304_v19 = vld [vmem:[%s443_s3 + $0x8] sm:$0xff]   ;;  %v285_v21 = vld [vmem:[%s444_s2] ss:$0 sm:$0xff]  ;;  %v298_v24 = vunpack.c.l.bf16 %v297_v20  ;;  %v299_v30 = vunpack.c.h.bf16 %v297_v20 }
   0x5   :  { %v302_v22 = vunpack.c.l.bf16 %v304_v19  ;;  %v303_v27 = vunpack.c.h.bf16 %v304_v19 }
   0x7   :  { %314 = vmatpush3.bf16.msra.mxu0 %v325_v2 }
   0x8   :  { %315 = vmatprep.subr.bf16.mxu0 %v326_v3  ;;  %v35_v7 = vld [vmem:[#allocation2 + $0x10] sm:$0xff]  ;;  %v33_v8 = vld [vmem:[#allocation2] sm:$0xff] }
   0x9   :  { %v36_v10 = vld [vmem:[#allocation2 + $0x18] sm:$0xff]  ;;  %v34_v13 = vld [vmem:[#allocation2 + $0x8] sm:$0xff] }
   0xb   :  { %316 = vmatpush3.bf16.msra.mxu0 %v326_v3 }
   0xc   :  { %317 = vmatprep.subr.bf16.mxu0 %v327_v5 }
   0xf   :  { %318 = vmatpush3.bf16.msra.mxu0 %v327_v5 }
  0x12   :  { %320 = vmatmul.mubr.msk.bf16.vlgmr.msra.gmra.mrb[0].mxu0 %vm28_vm0, %v329_v6 }
  0xe5   :  { %v321_v9 = vpop.f32.mrb[0].mxu0 }
  0xe6   :  { %v141_v11 = vadd.f32 %v321_v9, %v35_v7  ;;  %v124_v12 = vpop.f32.mrb[1].mxu0 }
  0xe7   :  { %v139_v14 = vadd.f32 %v124_v12, %v33_v8  ;;  %v322_v15 = vpop.f32.mrb[2].mxu0 }
  0xe8   :  { %145 = vst.msk [vmem:[#allocation2 + $0x10] sm:$0xff] %vm28_vm0, %v141_v11  ;;  %v142_v16 = vadd.f32 %v322_v15, %v36_v10  ;;  %v127_v17 = vpop.f32.mrb[3].mxu0  ;;  %v286_v11 = vld [vmem:[%s445_s4] ss:$0 sm:$0xff] }
  0xe9   :  { %143 = vst.msk [vmem:[#allocation2] sm:$0xff] %vm28_vm0, %v139_v14  ;;  %v140_v18 = vadd.f32 %v127_v17, %v34_v13  ;;  %v287_v13 = vld [vmem:[%s446_s5] ss:$0 sm:$0xff] }
  0xea   :  { %146 = vst.msk [vmem:[#allocation2 + $0x18] sm:$0xff] %vm28_vm0, %v142_v16 }
  0xeb   :  { %144 = vst.msk [vmem:[#allocation2 + $0x8] sm:$0xff] %vm28_vm0, %v140_v18 }
  0xef   :  { %v152_v23 = vld [vmem:[#allocation2 + $0x10] sm:$0xff] }
  0xf0   :  { %v163_v25 = vadd.f32 %v285_v21, %v152_v23  ;;  %v150_v26 = vld [vmem:[#allocation2] sm:$0xff] }
  0xf1   :  { %v161_v28 = vadd.f32 %v285_v21, %v150_v26  ;;  %v153_v29 = vld [vmem:[#allocation2 + $0x18] sm:$0xff] }
  0xf2   :  { %v175_v31 = vadd.f32 %v302_v22, %v163_v25  ;;  %v164_v32 = vadd.f32 %v285_v21, %v153_v29  ;;  %v151_v33 = vld [vmem:[#allocation2 + $0x8] sm:$0xff] }
  0xf3   :  { %v173_v34 = vadd.f32 %v298_v24, %v161_v28  ;;  %v162_v35 = vadd.f32 %v285_v21, %v151_v33 }
  0xf4   :  { %v183_v36 = vsel %vm28_vm0, %v175_v31, 0.0  ;;  %v176_v37 = vadd.f32 %v303_v27, %v164_v32 }
  0xf5   :  { %184 = vadd.xlane.f32.xlu1 %v183_v36  ;;  %v177_v38 = vsel %vm28_vm0, %v173_v34, 0.0  ;;  %v174_v39 = vadd.f32 %v299_v30, %v162_v35 }
  0xf6   :  { %178 = vadd.xlane.f32.xlu0 %v177_v38  ;;  %v186_v40 = vsel %vm28_vm0, %v176_v37, 0.0 }
  0xf7   :  { %v180_v41 = vsel %vm28_vm0, %v174_v39, 0.0 }
  0xf9   :  { %187 = vadd.xlane.f32.xlu1 %v186_v40 }
  0xfa   :  { %181 = vadd.xlane.f32.xlu0 %v180_v41 }
 0x182   :  { %v185_v42 = vpop.xlane.xlu1 %184 }
 0x183   :  { %v192_v43 = vmul.f32 0.015625, %v185_v42  ;;  %v179_v44 = vpop.xlane.xlu0 %178 }
 0x184   :  { %v190_v45 = vmul.f32 0.015625, %v179_v44 }
 0x185   :  { %v196_v46 = vsub.f32 %v175_v31, %v192_v43 }
 0x186   :  { %v194_v47 = vsub.f32 %v173_v34, %v190_v45  ;;  %v188_v48 = vpop.xlane.xlu1 %187 }
 0x187   :  { %v193_v49 = vmul.f32 0.015625, %v188_v48  ;;  %v182_v50 = vpop.xlane.xlu0 %181  ;;  %v200_v56 = vmul.f32 %v196_v46, %v196_v46 }
 0x188   :  { %v191_v51 = vmul.f32 0.015625, %v182_v50  ;;  %v198_v52 = vmul.f32 %v194_v47, %v194_v47 }
 0x189   :  { %v197_v53 = vsub.f32 %v176_v37, %v193_v49  ;;  %v208_v58 = vsel %vm28_vm0, %v200_v56, 0.0 }
 0x18a   :  { %v195_v54 = vsub.f32 %v174_v39, %v191_v51  ;;  %v202_v55 = vsel %vm28_vm0, %v198_v52, 0.0 }
 0x18b   :  { %203 = vadd.xlane.f32.xlu0 %v202_v55  ;;  %v201_v60 = vmul.f32 %v197_v53, %v197_v53 }
 0x18c   :  { %v199_v57 = vmul.f32 %v195_v54, %v195_v54 }
 0x18d   :  { %v211_v61 = vsel %vm28_vm0, %v201_v60, 0.0 }
 0x18e   :  { %v205_v59 = vsel %vm28_vm0, %v199_v57, 0.0 }
 0x18f   :  { %209 = vadd.xlane.f32.xlu0 %v208_v58  ;;  %206 = vadd.xlane.f32.xlu1 %v205_v59 }
 0x193   :  { %212 = vadd.xlane.f32.xlu1 %v211_v61 }
 0x218   :  { %v204_v62 = vpop.xlane.xlu0 %203 }
 0x219   :  { %v214_v63 = vmul.f32 0.015625, %v204_v62 }
 0x21b   :  { %v218_v0 = vadd.f32 1e-12, %v214_v63 }
 0x21c   :  { %v207_v1 = vpop.xlane.xlu1 %206  ;;  %v210_v2 = vpop.xlane.xlu0 %209 }
 0x21d   :  { %330 = vrsqrt.f32 %v218_v0  ;;  %v215_v3 = vmul.f32 0.015625, %v207_v1  ;;  %v216_v4 = vmul.f32 0.015625, %v210_v2 }
 0x21f   :  { %v219_v5 = vadd.f32 1e-12, %v215_v3  ;;  %v220_v6 = vadd.f32 1e-12, %v216_v4 }
 0x220   :  { %v213_v7 = vpop.xlane.xlu1 %212 }
 0x221   :  { %332 = vrsqrt.f32 %v219_v5  ;;  %v217_v8 = vmul.f32 0.015625, %v213_v7 }
 0x222   :  { %334 = vrsqrt.f32 %v220_v6 }
 0x223   :  { %v221_v9 = vadd.f32 1e-12, %v217_v8 }
 0x225   :  { %336 = vrsqrt.f32 %v221_v9 }
 0x227   :  { %v331_v10 = vpop.eup %330 }
 0x228   :  { %v226_v12 = vmul.f32 %v331_v10, %v194_v47 }
 0x22a   :  { %v237_v14 = vmul.f32 %v286_v11, %v226_v12 }
 0x22b   :  { %v333_v15 = vpop.eup %332 }
 0x22c   :  { %v335_v16 = vpop.eup %334  ;;  %v248_v17 = vadd.f32 %v287_v13, %v237_v14  ;;  %v227_v18 = vmul.f32 %v333_v15, %v195_v54 }
 0x22d   :  { %v228_v19 = vmul.f32 %v335_v16, %v196_v46 }
 0x22e   :  { %v292_v20 = vpack.c.bf16 %v248_v17, %v248_v17  ;;  %v238_v21 = vmul.f32 %v286_v11, %v227_v18 }
 0x22f   :  { %v337_v22 = vpop.eup %336  ;;  %v239_v23 = vmul.f32 %v286_v11, %v228_v19 }
 0x230   :  { %269 = vst.msk [vmem:[%s447_s6] sm:$0xf] %vm268_vm1, %v292_v20  ;;  %v249_v24 = vadd.f32 %v287_v13, %v238_v21  ;;  %v229_v25 = vmul.f32 %v337_v22, %v197_v53 }
 0x231   :  { %v250_v26 = vadd.f32 %v287_v13, %v239_v23 }
 0x232   :  { %v293_v27 = vpack.c.bf16 %v249_v24, %v249_v24  ;;  %v240_v28 = vmul.f32 %v286_v11, %v229_v25 }
 0x233   :  { %v294_v29 = vpack.c.bf16 %v250_v26, %v250_v26 }
 0x234   :  { %270 = vst.msk [vmem:[%s447_s6 + $0x4] sm:$0xf] %vm268_vm1, %v293_v27  ;;  %v251_v30 = vadd.f32 %v287_v13, %v240_v28 }
 0x235   :  { %271 = vst.msk [vmem:[%s447_s6 + $0x8] sm:$0xf] %vm268_vm1, %v294_v29 }
 0x236   :  { %v295_v31 = vpack.c.bf16 %v251_v30, %v251_v30 }
 0x238   :  { %272 = vst.msk [vmem:[%s447_s6 + $0xc] sm:$0xf] %vm268_vm1, %v295_v31 }

// kernel: bert_forward.10
= control target key start
LH: loop header
LB: loop body
LE: loop exit
PB: predicated region body
PF: predicated region fallthrough
CT: control target
= control target key end

     0   :  { %vm31_vm0 = vcmask 523264   ;;  %v554_v14 = vmov 0.0   ;;  %vm429_vm1 = vcmask 519168   ;;  %s689_s1 = inlined_call_operand.vmem [shape: bf16[64,128], index: 1, kind: input, shape index: {}]   ;;  %s690_s0 = inlined_call_operand.vmem [shape: bf16[32,64], index: 0, kind: input, shape index: {}]   ;;  %s691_s3 = inlined_call_operand.vmem [shape: bf16[128,64], index: 3, kind: input, shape index: {}]   ;;  %s692_s2 = inlined_call_operand.vmem [shape: f32[1,128], index: 2, kind: input, shape index: {}]   ;;  %s693_s4 = inlined_call_operand.vmem [shape: f32[1,64], index: 4, kind: input, shape index: {}]   ;;  %s694_s5 = inlined_call_operand.vmem [shape: f32[1,64], index: 5, kind: input, shape index: {}]   ;;  %s695_s6 = inlined_call_operand.vmem [shape: f32[1,64], index: 6, kind: input, shape index: {}]   ;;  %s696_s7 = inlined_call_operand.vmem [shape: bf16[32,64], index: 7, kind: output, shape index: {}]  }
   0x1   :  { %v524_v0 = vld [vmem:[%s689_s1] sm:$0xff]   ;;  %v525_v1 = vld [vmem:[%s689_s1 + $0x8] sm:$0xff]   ;;  %v526_v2 = vld [vmem:[%s689_s1 + $0x10] sm:$0xff]   ;;  %34 = vst.msk [vmem:[#allocation2 + $0x10] sm:$0xff] %vm31_vm0, %v554_v14 }
   0x2   :  { %491 = vmatprep.subr.bf16.mxu0 %v524_v0  ;;  %v528_v3 = vld [vmem:[%s690_s0] sm:$0xff]   ;;  %v527_v4 = vld [vmem:[%s689_s1 + $0x18] sm:$0xff]   ;;  %v529_v5 = vld [vmem:[%s690_s0 + $0x8] sm:$0xff]   ;;  %32 = vst.msk [vmem:[#allocation2] sm:$0xff] %vm31_vm0, %v554_v14 }
   0x3   :  { %492 = vmatpush3.bf16.msra.mxu0 %v524_v0  ;;  %499 = vmatprep.mubr.msk.bf16.mxu0 %vm31_vm0, %v528_v3  ;;  %v530_v6 = vld [vmem:[%s691_s3] sm:$0xff]   ;;  %v531_v7 = vld [vmem:[%s691_s3 + $0x8] sm:$0xff]   ;;  %v532_v8 = vld [vmem:[%s691_s3 + $0x10] sm:$0xff]   ;;  %33 = vst.msk [vmem:[#allocation2 + $0x8] sm:$0xff] %vm31_vm0, %v554_v14 }
   0x4   :  { %493 = vmatprep.subr.bf16.mxu0 %v525_v1  ;;  %503 = vmatprep.subr.bf16.mxu1 %v530_v6  ;;  %v533_v9 = vld [vmem:[%s691_s3 + $0x18] sm:$0xff]   ;;  %v534_v10 = vld [vmem:[%s691_s3 + $0x20] sm:$0xff]   ;;  %v535_v11 = vld [vmem:[%s691_s3 + $0x28] sm:$0xff]   ;;  %35 = vst.msk [vmem:[#allocation2 + $0x18] sm:$0xff] %vm31_vm0, %v554_v14 }
   0x5   :  { %504 = vmatpush3.bf16.msra.mxu1 %v530_v6  ;;  %v536_v12 = vld [vmem:[%s691_s3 + $0x30] sm:$0xff]   ;;  %v537_v13 = vld [vmem:[%s691_s3 + $0x38] sm:$0xff]   ;;  %v438_v15 = vld [vmem:[%s692_s2] ss:$0 sm:$0xff] }
   0x6   :  { %505 = vmatprep.subr.bf16.mxu1 %v531_v7 }
   0x7   :  { %494 = vmatpush3.bf16.msra.mxu0 %v525_v1 }
   0x8   :  { %495 = vmatprep.subr.bf16.mxu0 %v526_v2  ;;  %v185_v62 = vld [vmem:[#allocation2 + $0x10] sm:$0xff] }
   0x9   :  { %506 = vmatpush3.bf16.msra.mxu1 %v531_v7  ;;  %v183_v63 = vld [vmem:[#allocation2] sm:$0xff] }
   0xa   :  { %507 = vmatprep.subr.bf16.mxu1 %v532_v8 }
   0xb   :  { %496 = vmatpush3.bf16.msra.mxu0 %v526_v2  ;;  %v186_v1 = vld [vmem:[#allocation2 + $0x18] sm:$0xff] }
   0xc   :  { %497 = vmatprep.subr.bf16.mxu0 %v527_v4 }
   0xd   :  { %508 = vmatpush3.bf16.msra.mxu1 %v532_v8 }
   0xe   :  { %509 = vmatprep.subr.bf16.mxu1 %v533_v9 }
   0xf   :  { %498 = vmatpush3.bf16.msra.mxu0 %v527_v4  ;;  %v184_v4 = vld [vmem:[#allocation2 + $0x8] sm:$0xff] }
  0x11   :  { %510 = vmatpush3.bf16.msra.mxu1 %v533_v9 }
  0x12   :  { %500 = vmatmul.mubr.msk.bf16.vlgmr.msra.gmra.mrb[0].mxu0 %vm31_vm0, %v529_v5  ;;  %511 = vmatprep.subr.bf16.mxu1 %v534_v10 }
  0x15   :  { %512 = vmatpush3.bf16.msra.mxu1 %v534_v10  ;;  %v474_v10 = vld [vmem:[%s690_s0 + $0x8] sm:$0xff]  }
  0x16   :  { %513 = vmatprep.subr.bf16.mxu1 %v535_v11 }
  0x19   :  { %514 = vmatpush3.bf16.msra.mxu1 %v535_v11  ;;  %v467_v11 = vld [vmem:[%s690_s0] sm:$0xff]  }
  0x1a   :  { %515 = vmatprep.subr.bf16.mxu1 %v536_v12 }
  0x1d   :  { %516 = vmatpush3.bf16.msra.mxu1 %v536_v12  ;;  %v455_v12 = vld [vmem:[%s693_s4] ss:$0 sm:$0xff] }
  0x1e   :  { %517 = vmatprep.subr.bf16.mxu1 %v537_v13 }
  0x21   :  { %518 = vmatpush3.bf16.msra.mxu1 %v537_v13  ;;  %v472_v13 = vunpack.c.l.bf16 %v474_v10 }
  0xe5   :  { %v501_v16 = vpop.f32.mrb[0].mxu0 }
  0xe6   :  { %v139_v17 = vadd.f32 %v501_v16, %v438_v15  ;;  %v130_v18 = vpop.f32.mrb[1].mxu0 }
  0xe7   :  { %v131_v19 = vadd.f32 %v438_v15, %v130_v18  ;;  %v502_v20 = vpop.f32.mrb[2].mxu0  ;;  %v473_v18 = vunpack.c.h.bf16 %v474_v10 }
  0xe8   :  { %v147_v21 = vmul.f32 %v139_v17, %v139_v17  ;;  %v142_v22 = vadd.f32 %v502_v20, %v438_v15  ;;  %v133_v23 = vpop.f32.mrb[3].mxu0 }
  0xe9   :  { %v145_v24 = vmul.f32 %v131_v19, %v131_v19  ;;  %v134_v25 = vadd.f32 %v438_v15, %v133_v23  ;;  %v468_v15 = vunpack.c.l.bf16 %v467_v11 }
  0xea   :  { %v151_v26 = vmul.f32 %v147_v21, %v139_v17  ;;  %v148_v27 = vmul.f32 %v142_v22, %v142_v22  ;;  %v469_v21 = vunpack.c.h.bf16 %v467_v11 }
  0xeb   :  { %v149_v28 = vmul.f32 %v145_v24, %v131_v19  ;;  %v146_v29 = vmul.f32 %v134_v25, %v134_v25 }
  0xec   :  { %v155_v30 = vmul.f32 0.044715, %v151_v26  ;;  %v152_v31 = vmul.f32 %v148_v27, %v142_v22 }
  0xed   :  { %v153_v32 = vmul.f32 0.044715, %v149_v28  ;;  %v150_v33 = vmul.f32 %v146_v29, %v134_v25 }
  0xee   :  { %v159_v34 = vadd.f32 %v155_v30, %v139_v17  ;;  %v156_v35 = vmul.f32 0.044715, %v152_v31 }
  0xef   :  { %v154_v36 = vmul.f32 0.044715, %v150_v33  ;;  %v157_v37 = vadd.f32 %v153_v32, %v131_v19 }
  0xf0   :  { %v163_v38 = vmul.f32 0.7978846, %v159_v34  ;;  %v160_v39 = vadd.f32 %v156_v35, %v142_v22 }
  0xf1   :  { %v158_v40 = vadd.f32 %v154_v36, %v134_v25  ;;  %v161_v41 = vmul.f32 0.7978846, %v157_v37 }
  0xf2   :  { %538 = vtanh.f32 %v163_v38  ;;  %v164_v42 = vmul.f32 0.7978846, %v160_v39 }
  0xf3   :  { %v162_v43 = vmul.f32 0.7978846, %v158_v40  ;;  %540 = vtanh.f32 %v161_v41 }
  0xf4   :  { %542 = vtanh.f32 %v164_v42 }
  0xf5   :  { %544 = vtanh.f32 %v162_v43 }
  0xfc   :  { %v539_v44 = vpop.eup %538 }
  0xfd   :  { %v541_v45 = vpop.eup %540  ;;  %v171_v46 = vadd.f32 1.0, %v539_v44 }
  0xfe   :  { %v543_v47 = vpop.eup %542  ;;  %v169_v48 = vadd.f32 1.0, %v541_v45 }
  0xff   :  { %v545_v49 = vpop.eup %544  ;;  %v172_v50 = vadd.f32 1.0, %v543_v47  ;;  %v175_v51 = vmul.f32 0.5, %v171_v46 }
 0x100   :  { %v170_v52 = vadd.f32 1.0, %v545_v49  ;;  %v173_v53 = vmul.f32 0.5, %v169_v48 }
 0x101   :  { %v176_v54 = vmul.f32 0.5, %v172_v50  ;;  %v179_v56 = vmul.f32 %v175_v51, %v139_v17 }
 0x102   :  { %v174_v55 = vmul.f32 0.5, %v170_v52  ;;  %v177_v58 = vmul.f32 %v173_v53, %v131_v19 }
 0x103   :  { %v180_v57 = vmul.f32 %v176_v54, %v142_v22 }
 0x104   :  { %v178_v59 = vmul.f32 %v174_v55, %v134_v25 }
 0x105   :  { %v182_v60 = vpack.c.bf16 %v180_v57, %v179_v56 }
 0x106   :  { %v181_v61 = vpack.c.bf16 %v178_v59, %v177_v58 }
 0x108   :  { %519 = vmatprep.mubr.bf16.mxu1 %v181_v61 }
 0x109   :  { %520 = vmatmul.mubr.bf16.vlgmr.msra.gmra.mrb[0].mxu1 %v182_v60 }
 0x1dc   :  { %v521_v0 = vpop.f32.mrb[0].mxu1 }
 0x1dd   :  { %v302_v2 = vadd.f32 %v521_v0, %v185_v62  ;;  %v285_v3 = vpop.f32.mrb[1].mxu1 }
 0x1de   :  { %v300_v5 = vadd.f32 %v285_v3, %v183_v63  ;;  %v522_v6 = vpop.f32.mrb[2].mxu1 }
 0x1df   :  { %306 = vst.msk [vmem:[#allocation2 + $0x10] sm:$0xff] %vm31_vm0, %v302_v2  ;;  %v303_v7 = vadd.f32 %v522_v6, %v186_v1  ;;  %v288_v8 = vpop.f32.mrb[3].mxu1  ;;  %v456_v2 = vld [vmem:[%s694_s5] ss:$0 sm:$0xff] }
 0x1e0   :  { %304 = vst.msk [vmem:[#allocation2] sm:$0xff] %vm31_vm0, %v300_v5  ;;  %v301_v9 = vadd.f32 %v288_v8, %v184_v4  ;;  %v457_v4 = vld [vmem:[%s695_s6] ss:$0 sm:$0xff] }
 0x1e1   :  { %307 = vst.msk [vmem:[#allocation2 + $0x18] sm:$0xff] %vm31_vm0, %v303_v7 }
 0x1e2   :  { %305 = vst.msk [vmem:[#allocation2 + $0x8] sm:$0xff] %vm31_vm0, %v301_v9 }
 0x1e6   :  { %v313_v14 = vld [vmem:[#allocation2 + $0x10] sm:$0xff] }
 0x1e7   :  { %v324_v16 = vadd.f32 %v455_v12, %v313_v14  ;;  %v311_v17 = vld [vmem:[#allocation2] sm:$0xff] }
 0x1e8   :  { %v322_v19 = vadd.f32 %v455_v12, %v311_v17  ;;  %v314_v20 = vld [vmem:[#allocation2 + $0x18] sm:$0xff] }
 0x1e9   :  { %v336_v22 = vadd.f32 %v472_v13, %v324_v16  ;;  %v325_v23 = vadd.f32 %v455_v12, %v314_v20  ;;  %v312_v24 = vld [vmem:[#allocation2 + $0x8] sm:$0xff] }
 0x1ea   :  { %v334_v25 = vadd.f32 %v468_v15, %v322_v19  ;;  %v323_v26 = vadd.f32 %v455_v12, %v312_v24 }
 0x1eb   :  { %v344_v27 = vsel %vm31_vm0, %v336_v22, 0.0  ;;  %v337_v28 = vadd.f32 %v473_v18, %v325_v23 }
 0x1ec   :  { %345 = vadd.xlane.f32.xlu1 %v344_v27  ;;  %v338_v29 = vsel %vm31_vm0, %v334_v25, 0.0  ;;  %v335_v30 = vadd.f32 %v469_v21, %v323_v26 }
 0x1ed   :  { %339 = vadd.xlane.f32.xlu0 %v338_v29  ;;  %v347_v31 = vsel %vm31_vm0, %v337_v28, 0.0 }
 0x1ee   :  { %v341_v32 = vsel %vm31_vm0, %v335_v30, 0.0 }
 0x1f0   :  { %348 = vadd.xlane.f32.xlu1 %v347_v31 }
 0x1f1   :  { %342 = vadd.xlane.f32.xlu0 %v341_v32 }
 0x279   :  { %v346_v33 = vpop.xlane.xlu1 %345 }
 0x27a   :  { %v353_v34 = vmul.f32 0.015625, %v346_v33  ;;  %v340_v35 = vpop.xlane.xlu0 %339 }
 0x27b   :  { %v351_v36 = vmul.f32 0.015625, %v340_v35 }
 0x27c   :  { %v357_v37 = vsub.f32 %v336_v22, %v353_v34 }
 0x27d   :  { %v355_v38 = vsub.f32 %v334_v25, %v351_v36  ;;  %v349_v39 = vpop.xlane.xlu1 %348 }
 0x27e   :  { %v354_v40 = vmul.f32 0.015625, %v349_v39  ;;  %v343_v41 = vpop.xlane.xlu0 %342  ;;  %v361_v47 = vmul.f32 %v357_v37, %v357_v37 }
 0x27f   :  { %v352_v42 = vmul.f32 0.015625, %v343_v41  ;;  %v359_v43 = vmul.f32 %v355_v38, %v355_v38 }
 0x280   :  { %v358_v44 = vsub.f32 %v337_v28, %v354_v40  ;;  %v369_v49 = vsel %vm31_vm0, %v361_v47, 0.0 }
 0x281   :  { %v356_v45 = vsub.f32 %v335_v30, %v352_v42  ;;  %v363_v46 = vsel %vm31_vm0, %v359_v43, 0.0 }
 0x282   :  { %364 = vadd.xlane.f32.xlu0 %v363_v46  ;;  %v362_v51 = vmul.f32 %v358_v44, %v358_v44 }
 0x283   :  { %v360_v48 = vmul.f32 %v356_v45, %v356_v45 }
 0x284   :  { %v372_v52 = vsel %vm31_vm0, %v362_v51, 0.0 }
 0x285   :  { %v366_v50 = vsel %vm31_vm0, %v360_v48, 0.0 }
 0x286   :  { %370 = vadd.xlane.f32.xlu0 %v369_v49  ;;  %367 = vadd.xlane.f32.xlu1 %v366_v50 }
 0x28a   :  { %373 = vadd.xlane.f32.xlu1 %v372_v52 }
 0x30f   :  { %v365_v53 = vpop.xlane.xlu0 %364 }
 0x310   :  { %v375_v54 = vmul.f32 0.015625, %v365_v53 }
 0x312   :  { %v379_v55 = vadd.f32 1e-12, %v375_v54 }
 0x313   :  { %v368_v56 = vpop.xlane.xlu1 %367  ;;  %v371_v57 = vpop.xlane.xlu0 %370 }
 0x314   :  { %546 = vrsqrt.f32 %v379_v55  ;;  %v376_v58 = vmul.f32 0.015625, %v368_v56  ;;  %v377_v59 = vmul.f32 0.015625, %v371_v57 }
 0x316   :  { %v380_v60 = vadd.f32 1e-12, %v376_v58  ;;  %v381_v61 = vadd.f32 1e-12, %v377_v59 }
 0x317   :  { %v374_v62 = vpop.xlane.xlu1 %373 }
 0x318   :  { %548 = vrsqrt.f32 %v380_v60  ;;  %v378_v63 = vmul.f32 0.015625, %v374_v62 }
 0x319   :  { %550 = vrsqrt.f32 %v381_v61 }
 0x31a   :  { %v382_v0 = vadd.f32 1e-12, %v378_v63 }
 0x31c   :  { %552 = vrsqrt.f32 %v382_v0 }
 0x31e   :  { %v547_v1 = vpop.eup %546 }
 0x31f   :  { %v387_v3 = vmul.f32 %v547_v1, %v355_v38 }
 0x321   :  { %v398_v5 = vmul.f32 %v456_v2, %v387_v3 }
 0x322   :  { %v549_v6 = vpop.eup %548 }
 0x323   :  { %v551_v7 = vpop.eup %550  ;;  %v409_v8 = vadd.f32 %v457_v4, %v398_v5  ;;  %v388_v9 = vmul.f32 %v549_v6, %v356_v45 }
 0x324   :  { %v389_v10 = vmul.f32 %v551_v7, %v357_v37 }
 0x325   :  { %v462_v11 = vpack.c.bf16 %v409_v8, %v409_v8  ;;  %v399_v12 = vmul.f32 %v456_v2, %v388_v9 }
 0x326   :  { %v553_v13 = vpop.eup %552  ;;  %v400_v14 = vmul.f32 %v456_v2, %v389_v10 }
 0x327   :  { %430 = vst.msk [vmem:[%s696_s7] sm:$0xf] %vm429_vm1, %v462_v11  ;;  %v410_v15 = vadd.f32 %v457_v4, %v399_v12  ;;  %v390_v16 = vmul.f32 %v553_v13, %v358_v44 }
 0x328   :  { %v411_v17 = vadd.f32 %v457_v4, %v400_v14 }
 0x329   :  { %v463_v18 = vpack.c.bf16 %v410_v15, %v410_v15  ;;  %v401_v19 = vmul.f32 %v456_v2, %v390_v16 }
 0x32a   :  { %v464_v20 = vpack.c.bf16 %v411_v17, %v411_v17 }
 0x32b   :  { %431 = vst.msk [vmem:[%s696_s7 + $0x4] sm:$0xf] %vm429_vm1, %v463_v18  ;;  %v412_v21 = vadd.f32 %v457_v4, %v401_v19 }
 0x32c   :  { %432 = vst.msk [vmem:[%s696_s7 + $0x8] sm:$0xf] %vm429_vm1, %v464_v20 }
 0x32d   :  { %v465_v22 = vpack.c.bf16 %v412_v21, %v412_v21 }
 0x32f   :  { %433 = vst.msk [vmem:[%s696_s7 + $0xc] sm:$0xf] %vm429_vm1, %v465_v22 }

// kernel: bert_forward.8
= control target key start
LH: loop header
LB: loop body
LE: loop exit
PB: predicated region body
PF: predicated region fallthrough
CT: control target
= control target key end

     0   :  { %s1397_s27 = smov 0   ;;  %s1399_s28 = smov 0   ;;  %s1538_s0 = inlined_call_operand.vmem [shape: bf16[2,16,64], index: 0, kind: input, shape index: {}]   ;;  %s1539_s1 = inlined_call_operand.vmem [shape: bf16[64,64], index: 1, kind: input, shape index: {}]   ;;  %s1540_s2 = inlined_call_operand.vmem [shape: bf16[64,64], index: 2, kind: input, shape index: {}]   ;;  %s1541_s3 = inlined_call_operand.vmem [shape: bf16[64,64], index: 3, kind: input, shape index: {}]   ;;  %s1542_s4 = inlined_call_operand.vmem [shape: f32[1,64], index: 4, kind: input, shape index: {}]   ;;  %s1543_s5 = inlined_call_operand.vmem [shape: f32[1,64], index: 5, kind: input, shape index: {}]   ;;  %s1544_s6 = inlined_call_operand.vmem [shape: f32[1,64], index: 6, kind: input, shape index: {}]   ;;  %s1545_s7 = inlined_call_operand.vmem [shape: f32[2,1,16], index: 7, kind: input, shape index: {}]   ;;  %s1546_s8 = inlined_call_operand.vmem [shape: bf16[2,16,64], index: 8, kind: output, shape index: {}]  }
   0x1   :  { %s1401_s29 = smov 0  }
   0x2 LB: > { %s30_s30 = sadd.s32 1, %s1342_s28  ;;  %p1147_p0 = scmp.ge.s32.totalorder %s1346_s29, 1  ;;  %s1346_s29 = sphi %s1401_s29, %s18_s29   ;;  %s1342_s28 = sphi %s1399_s28, %s1548_s28   ;;  %s1338_s27 = sphi %s1397_s27, %s1547_s27  }
   0x3   : > { %p32_p1 = scmp.ge.s32.totalorder %s30_s30, 2  ;;  %p335_p2 = scmp.lt.s32.totalorder %s1346_s29, 3 }
   0x5   : > { %s1550_s30 = smov (%p32_p1, %s30_s30), 0  ;;  %p336_p3 = pnand %p1147_p0, %p335_p2 }
   0x6   : > { %v1295_v0 = vld [vmem:[%s1540_s2] sm:$0xff] (!%p336_p3)   ;;  %v1348_v1 = vmov (!%p336_p3), 0.0   ;;  %v1296_v2 = vld [vmem:[%s1540_s2 + $0x8] sm:$0xff] (!%p336_p3)   ;;  %vm1349_vm0 = vmmov (!%p336_p3), 0   ;;  %p396_p4 = scmp.lt.s32.totalorder (!%p336_p3), %s1338_s27, 1  ;;  %v1298_v5 = vld [vmem:[%s1540_s2 + $0x10] sm:$0xff] (!%p336_p3)  }
   0x7   : > { %339 = sbr.rel (%p336_p3) target bundleno = 1240 (0x4d8), region = 52  ;;  %1219 = vmatprep.subr.bf16.mxu1 (!%p336_p3), %v1348_v1  ;;  %1207 = vmatprep.subr.bf16.mxu0 (!%p336_p3), %v1348_v1  ;;  %v1297_v3 = vld [vmem:[%s1539_s1] sm:$0xff] (!%p336_p3)   ;;  %v1299_v4 = vld [vmem:[%s1539_s1 + $0x8] sm:$0xff] (!%p336_p3)   ;;  %v1301_v6 = vld [vmem:[%s1539_s1 + $0x10] sm:$0xff] (!%p336_p3)   ;;  %vm481_vm1 = vcmask (!%p336_p3), 523264   ;;  %vm689_vm2 = vcmask (!%p336_p3), 261120  }
   0x8   : > { %1220 = vmatpush3.bf16.msra.mxu1 (!%p336_p3), %v1295_v0  ;;  %1227 = vmatprep.mubr.msk.bf16.mxu1 (!%p336_p3), %vm1349_vm0, %v1348_v1  ;;  %v1300_v7 = vld [vmem:[%s1540_s2 + $0x18] sm:$0xff] (!%p336_p3)   ;;  %v1304_v10 = vld [vmem:[%s1541_s3] sm:$0xff] (!%p336_p3)   ;;  %v1305_v11 = vld [vmem:[%s1541_s3 + $0x8] sm:$0xff] (!%p336_p3)   ;;  %s1350_s24 = smov (!%p336_p3), 96   ;;  %vm747_vm3 = vcmask (!%p336_p3), 130048   ;;  %s1351_s12 = smov (!%p336_p3), 32  }
   0x9   : > { %1221 = vmatprep.subr.bf16.mxu1 (!%p336_p3), %v1348_v1  ;;  %1215 = vmatprep.mubr.msk.bf16.mxu0 (!%p336_p3), %vm1349_vm0, %v1348_v1  ;;  %v1303_v8 = vld [vmem:[%s1539_s1 + $0x18] sm:$0xff] (!%p336_p3)   ;;  %v1306_v12 = vld [vmem:[%s1541_s3 + $0x10] sm:$0xff] (!%p336_p3)   ;;  %v1159_v14 = vld [vmem:[%s1543_s5] ss:$0 sm:$0xff] (!%p336_p3)  ;;  %vm953_vm4 = vcmask (!%p336_p3), 523520   ;;  %vm966_vm5 = vcmask (!%p336_p3), 519168  }
   0xa   : > { %1208 = vmatpush3.bf16.msra.mxu0 (!%p336_p3), %v1297_v3  ;;  %v1307_v13 = vld [vmem:[%s1541_s3 + $0x18] sm:$0xff] (!%p336_p3)   ;;  %v1152_v16 = vld [vmem:[%s1542_s4] ss:$0 sm:$0xff] (!%p336_p3) }
   0xb   : > { %1209 = vmatprep.subr.bf16.mxu0 (!%p336_p3), %v1348_v1  ;;  %v1165_v31 = vld [vmem:[%s1544_s6] ss:$0 sm:$0xff] (!%p336_p3) }
   0xc   : > { %1222 = vmatpush3.bf16.msra.mxu1 (!%p336_p3), %v1296_v2 }
   0xd   : > { %1223 = vmatprep.subr.bf16.mxu1 (!%p336_p3), %v1348_v1 }
   0xe   : > { %s1552_s27 = smov (!%p396_p4, %s1338_s27), 1  ;;  %1210 = vmatpush3.bf16.msra.mxu0 %v1299_v4 }
   0xf   : > { %s1180_s19 = sshll.u32 %s1552_s27, 3  ;;  %1211 = vmatprep.subr.bf16.mxu0 %v1348_v1  ;;  %s424_s11 = scalar_lea.vmem %s1545_s7, %s1552_s27 }
  0x10   : > { %s400_s22 = scalar_lea.vmem %s1538_s0, %s1180_s19  ;;  %1224 = vmatpush3.bf16.msra.mxu1 %v1298_v5  ;;  %v1172_v43 = vld [vmem:[%s424_s11] ss:$0 sm:$0xff]  ;;  %s432_s15 = scalar_lea.vmem %s1546_s8, %s1180_s19 }
  0x11   : > { %1225 = vmatprep.subr.bf16.mxu1 %v1348_v1  ;;  %v1302_v9 = vld [vmem:[%s400_s22] sm:$0xff]  }
  0x12   : > { %1212 = vmatpush3.bf16.msra.mxu0 %v1301_v6 }
  0x13   : > { %1213 = vmatprep.subr.bf16.mxu0 %v1348_v1 }
  0x14   : > { %1226 = vmatpush3.bf16.msra.mxu1 %v1300_v7 }
  0x15   : > { %1243 = vmatprep.subr.bf16.mxu1 %v1348_v1 }
  0x16   : > { %1214 = vmatpush3.bf16.msra.mxu0 %v1303_v8 }
  0x17   : > { %1228 = vmatmul.mubr.msk.bf16.vlgmr.msra.gmra.mrb[0].mxu1 %vm481_vm1, %v1302_v9  ;;  %1231 = vmatprep.subr.bf16.mxu0 %v1348_v1 }
  0x18   : > { %1245 = vmatprep.mubr.msk.bf16.mxu1 %vm1349_vm0, %v1348_v1 }
  0x19   : > { %1216 = vmatmul.mubr.msk.bf16.vlgmr.msra.gmra.mrb[0].mxu0 %vm481_vm1, %v1302_v9 }
  0x1a   : > { %1239 = vmatprep.mubr.msk.bf16.mxu0 %vm1349_vm0, %v1348_v1  ;;  %1232 = vmatpush3.bf16.msra.mxu0 %v1304_v10 }
  0x1b   : > { %1233 = vmatprep.subr.bf16.mxu0 %v1348_v1 }
  0x1e   : > { %1234 = vmatpush3.bf16.msra.mxu0 %v1305_v11 }
  0x1f   : > { %1235 = vmatprep.subr.bf16.mxu0 %v1348_v1 }
  0x22   : > { %1236 = vmatpush3.bf16.msra.mxu0 %v1306_v12 }
  0x23   : > { %1237 = vmatprep.subr.bf16.mxu0 %v1348_v1 }
  0x26   : > { %1238 = vmatpush3.bf16.msra.mxu0 %v1307_v13 }
  0x27   : > { %1255 = vmatprep.subr.bf16.mxu0 %v1348_v1 }
  0x29   : > { %1240 = vmatmul.mubr.msk.bf16.vlgmr.msra.gmra.mrb[4].mxu0 %vm481_vm1, %v1302_v9 }
  0x2a   : > { %1257 = vmatprep.mubr.msk.bf16.mxu0 %vm1349_vm0, %v1348_v1 }
  0xea   : > { %v600_v15 = vpop.f32.mrb[0].mxu1 }
  0xeb   : > { %v1229_v17 = vpop.f32.mrb[1].mxu1  ;;  %v601_v20 = vadd.f32 %v1159_v14, %v600_v15 }
  0xec   : > { %v603_v18 = vpop.f32.mrb[2].mxu1  ;;  %v519_v19 = vpop.f32.mrb[0].mxu0 }
  0xed   : > { %v604_v21 = vadd.f32 %v1159_v14, %v603_v18  ;;  %v1230_v22 = vpop.f32.mrb[3].mxu1  ;;  %v520_v23 = vadd.f32 %v1152_v16, %v519_v19  ;;  %v1217_v24 = vpop.f32.mrb[1].mxu0 }
  0xee   : > { %v522_v25 = vpop.f32.mrb[2].mxu0 }
  0xef   : > { %v607_v26 = vpack.c.bf16 %v604_v21, %v601_v20  ;;  %v523_v27 = vadd.f32 %v1152_v16, %v522_v25  ;;  %v1218_v28 = vpop.f32.mrb[3].mxu0 }
  0xf1   : > { %821 = vrot.lane.b32.xlu0 %v607_v26, %s1350_s24  ;;  %v526_v29 = vpack.c.bf16 %v523_v27, %v520_v23  ;;  %v694_v30 = vsel %vm689_vm2, %v607_v26, 0 }
  0xf2   : > { %1244 = vmatpush3.bf16.xpose.msra.mxu1 %v694_v30 }
  0xf3   : > { %1249 = vmatprep.subr.bf16.mxu1 %v1348_v1 }
  0xf5   : > { %818 = vrot.lane.b32.xlu0 %v526_v29, %s1350_s24 }
  0xf9   : > { %1246 = vmatmul.mubr.msk.bf16.vlgmr.msra.gmra.mrb[4].mxu1 %vm689_vm2, %v526_v29 }
  0xfa   : > { %1251 = vmatprep.mubr.msk.bf16.mxu1 %vm1349_vm0, %v1348_v1 }
  0xfc   : > { %v681_v32 = vpop.f32.mrb[4].mxu0 }
  0xfd   : > { %v682_v33 = vadd.f32 %v1165_v31, %v681_v32  ;;  %v1241_v34 = vpop.f32.mrb[5].mxu0 }
  0xfe   : > { %v684_v35 = vpop.f32.mrb[6].mxu0 }
  0xff   : > { %v685_v36 = vadd.f32 %v1165_v31, %v684_v35  ;;  %v1242_v37 = vpop.f32.mrb[7].mxu0 }
 0x101   : > { %v688_v38 = vpack.c.bf16 %v685_v36, %v682_v33 }
 0x103   : > { %1250 = vmatpush3.bf16.msra.mxu1 %v688_v38 }
 0x104   : > { %1261 = vmatprep.subr.bf16.mxu1 %v1348_v1 }
 0x163   : > { %v822_v39 = vpop.permute.xlu0 %821 }
 0x164   : > { %v827_v40 = vsel %vm689_vm2, %v822_v39, 0 }
 0x165   : > { %1256 = vmatpush3.bf16.xpose.msra.mxu0 %v827_v40 }
 0x167   : > { %v819_v41 = vpop.permute.xlu0 %818 }
 0x16c   : > { %1258 = vmatmul.mubr.msk.bf16.vlgmr.msra.gmra.mrb[8].mxu0 %vm689_vm2, %v819_v41 }
 0x1cc   : > { %v730_v42 = vpop.f32.mrb[4].mxu1 }
 0x1cd   : > { %v737_v44 = vmul.f32 0.17677669, %v730_v42  ;;  %v1247_v45 = vpop.f32.mrb[5].mxu1 }
 0x1ce   : > { %v733_v46 = vpop.f32.mrb[6].mxu1 }
 0x1cf   : > { %v738_v47 = vmul.f32 0.17677669, %v733_v46  ;;  %v1248_v48 = vpop.f32.mrb[7].mxu1  ;;  %v745_v49 = vadd.f32 %v1172_v43, %v737_v44 }
 0x1d1   : > { %v748_v50 = vsel %vm747_vm3, %v745_v49, -inf  ;;  %v746_v51 = vadd.f32 %v1172_v43, %v738_v47 }
 0x1d2   : > { %749 = vmax.xlane.f32.xlu1 %v748_v50 }
 0x1d3   : > { %v751_v52 = vsel %vm747_vm3, %v746_v51, -inf }
 0x1d6   : > { %752 = vmax.xlane.f32.xlu1 %v751_v52 }
 0x23f   : > { %v863_v53 = vpop.f32.mrb[8].mxu0 }
 0x240   : > { %v870_v54 = vmul.f32 0.17677669, %v863_v53  ;;  %v1259_v55 = vpop.f32.mrb[9].mxu0 }
 0x241   : > { %v866_v56 = vpop.f32.mrb[10].mxu0 }
 0x242   : > { %v871_v57 = vmul.f32 0.17677669, %v866_v56  ;;  %v1260_v58 = vpop.f32.mrb[11].mxu0  ;;  %v872_v59 = vadd.f32 %v1172_v43, %v870_v54 }
 0x244   : > { %v874_v60 = vsel %vm747_vm3, %v872_v59, -inf  ;;  %v873_v61 = vadd.f32 %v1172_v43, %v871_v57 }
 0x245   : > { %875 = vmax.xlane.f32.xlu0 %v874_v60 }
 0x246   : > { %v877_v62 = vsel %vm747_vm3, %v873_v61, -inf }
 0x247   : > { %878 = vmax.xlane.f32.xlu1 %v877_v62 }
 0x25f   : > { %v750_v63 = vpop.xlane.xlu1 %749 }
 0x260   : > { %v754_v0 = vsub.f32 %v745_v49, %v750_v63 }
 0x262   : > { %v756_v2 = vmul.f32 1.442695, %v754_v0 }
 0x263   : > { %v753_v3 = vpop.xlane.xlu1 %752 }
 0x264   : > { %1308 = vpow2.f32 %v756_v2  ;;  %v755_v4 = vsub.f32 %v746_v51, %v753_v3 }
 0x266   : > { %v758_v5 = vmul.f32 1.442695, %v755_v4 }
 0x268   : > { %1310 = vpow2.f32 %v758_v5 }
 0x26e   : > { %v1309_v6 = vpop.eup %1308 }
 0x26f   : > { %v760_v7 = vsel %vm747_vm3, %v1309_v6, 0.0 }
 0x270   : > { %761 = vadd.xlane.f32.xlu1 %v760_v7 }
 0x272   : > { %v1311_v8 = vpop.eup %1310 }
 0x273   : > { %v763_v9 = vsel %vm747_vm3, %v1311_v8, 0.0 }
 0x274   : > { %764 = vadd.xlane.f32.xlu1 %v763_v9 }
 0x2d2   : > { %v876_v10 = vpop.xlane.xlu0 %875 }
 0x2d3   : > { %v880_v11 = vsub.f32 %v872_v59, %v876_v10 }
 0x2d4   : > { %v879_v12 = vpop.xlane.xlu1 %878 }
 0x2d5   : > { %v882_v13 = vmul.f32 1.442695, %v880_v11  ;;  %v881_v14 = vsub.f32 %v873_v61, %v879_v12 }
 0x2d7   : > { %1312 = vpow2.f32 %v882_v13  ;;  %v884_v15 = vmul.f32 1.442695, %v881_v14 }
 0x2d9   : > { %1314 = vpow2.f32 %v884_v15 }
 0x2e1   : > { %v1313_v16 = vpop.eup %1312 }
 0x2e2   : > { %v886_v17 = vsel %vm747_vm3, %v1313_v16, 0.0 }
 0x2e3   : > { %v1315_v18 = vpop.eup %1314  ;;  %887 = vadd.xlane.f32.xlu1 %v886_v17 }
 0x2e4   : > { %v889_v19 = vsel %vm747_vm3, %v1315_v18, 0.0 }
 0x2e7   : > { %890 = vadd.xlane.f32.xlu1 %v889_v19 }
 0x2f8   : > { %898 = vrot.lane.b32.xlu1 %v688_v38, %s1350_s24 }
 0x2fd   : > { %v762_v20 = vpop.xlane.xlu1 %761 }
 0x2fe   : > { %1316 = vrcp.f32 %v762_v20 }
 0x301   : > { %v765_v21 = vpop.xlane.xlu1 %764 }
 0x302   : > { %1318 = vrcp.f32 %v765_v21 }
 0x308   : > { %v1317_v22 = vpop.eup %1316 }
 0x309   : > { %v768_v24 = vmul.f32 %v1317_v22, %v1309_v6 }
 0x30c   : > { %v1319_v23 = vpop.eup %1318 }
 0x30d   : > { %v769_v25 = vmul.f32 %v1319_v23, %v1311_v8 }
 0x30f   : > { %v770_v26 = vpack.c.bf16 %v769_v25, %v768_v24 }
 0x311   : > { %1252 = vmatmul.mubr.msk.bf16.vlgmr.msra.gmra.mrb[8].mxu1 %vm747_vm3, %v770_v26 }
 0x312   : > { %1263 = vmatprep.mubr.msk.bf16.mxu1 %vm1349_vm0, %v1348_v1 }
 0x370   : > { %v888_v27 = vpop.xlane.xlu1 %887 }
 0x371   : > { %1320 = vrcp.f32 %v888_v27 }
 0x374   : > { %v891_v28 = vpop.xlane.xlu1 %890 }
 0x375   : > { %1322 = vrcp.f32 %v891_v28 }
 0x378   : > { %v899_v29 = vpop.permute.xlu1 %898 }
 0x379   : > { %1262 = vmatpush3.bf16.msra.mxu1 %v899_v29 }
 0x37b   : > { %v1321_v30 = vpop.eup %1320 }
 0x37c   : > { %v894_v32 = vmul.f32 %v1321_v30, %v1313_v16 }
 0x37f   : > { %v1323_v31 = vpop.eup %1322 }
 0x380   : > { %v895_v33 = vmul.f32 %v1323_v31, %v1315_v18 }
 0x382   : > { %v896_v34 = vpack.c.bf16 %v895_v33, %v894_v32 }
 0x384   : > { %1264 = vmatmul.mubr.msk.bf16.vlgmr.msra.gmra.mrb[12].mxu1 %vm747_vm3, %v896_v34 }
 0x3e4   : > { %v808_v35 = vpop.f32.mrb[8].mxu1 }
 0x3e5   : > { %815 = vst.msk [vmem:[#allocation2] sm:$0xff] %vm689_vm2, %v808_v35  ;;  %v1253_v36 = vpop.f32.mrb[9].mxu1 }
 0x3e6   : > { %v811_v37 = vpop.f32.mrb[10].mxu1 }
 0x3e7   : > { %816 = vst.msk [vmem:[#allocation2 + $0x8] sm:$0xff] %vm689_vm2, %v811_v37  ;;  %v1254_v1 = vpop.f32.mrb[11].mxu1 }
 0x457   : > { %v938_v38 = vpop.f32.mrb[12].mxu1 }
 0x458   : > { %947 = vrot.lane.b32.xlu0 %v938_v38, %s1351_s12  ;;  %v1265_v39 = vpop.f32.mrb[13].mxu1 }
 0x459   : > { %v941_v40 = vpop.f32.mrb[14].mxu1 }
 0x45a   : > { %949 = vrot.lane.b32.xlu1 %v941_v40, %s1351_s12  ;;  %v1266_v41 = vpop.f32.mrb[15].mxu1 }
 0x4ca   : > { %v948_v42 = vpop.permute.xlu0 %947 }
 0x4cb   : > { %954 = vst.msk [vmem:[#allocation2] sm:$0xff] %vm953_vm4, %v948_v42 }
 0x4cc   : > { %v950_v43 = vpop.permute.xlu1 %949 }
 0x4cd   : > { %955 = vst.msk [vmem:[#allocation2 + $0x8] sm:$0xff] %vm953_vm4, %v950_v43 }
 0x4d2   : > { %v956_v44 = vld [vmem:[#allocation2] sm:$0xff] }
 0x4d3   : > { %v1182_v45 = vpack.c.bf16 %v956_v44, %v956_v44 }
 0x4d4   : > { %v957_v46 = vld [vmem:[#allocation2 + $0x8] sm:$0xff] }
 0x4d5   : > { %967 = vst.msk [vmem:[%s432_s15] sm:$0xf] %vm966_vm5, %v1182_v45  ;;  %v1183_v47 = vpack.c.bf16 %v957_v46, %v957_v46 }
 0x4d7   : > { %968 = vst.msk [vmem:[%s432_s15 + $0x4] sm:$0xf] %vm966_vm5, %v1183_v47 }
 0x4d8 PF: > { %s18_s29 = sadd.s32 1, %s1346_s29   ;;  %s1547_s27 = smov %s1342_s28 }
 0x4d9   : > { %p15_p5 = scmp.ge.s32.totalorder %s18_s29, 4   ;;  %s1548_s28 = smov %s1550_s30 }
 0x4db   :  { %17 = sbr.rel (!%p15_p5) target bundleno = 2 (0x2), region = 103 }

</bundles_post_ra>
